<compile_context>
chip_gen: v7x
topology: tpu7x:2x2x1
jax: 0.10.0
libtpu: 0.0.40
codegen_flags: <defaults>
</compile_context>

<pallas_src>
import jax
import jax.numpy as jnp
from jax import lax
from jax.experimental import pallas as pl
from jax.experimental.pallas import tpu as pltpu


def _rpn_head_kernel(xt_ref, xm_ref, xb_ref, wconv_ref, bconv_ref,
                     whead_ref, bhead_ref, cls_ref, del_ref,
                     mid_slab, left_slab, right_slab):
    """One (image, row-tile) grid step.

    xt_ref    : (1, 1, W, C)    top-halo row (clamped index; zeroed at border)
    xm_ref    : (1, TH, W, C)   main row tile, NHWC
    xb_ref    : (1, 1, W, C)    bottom-halo row
    wconv_ref : (3, 3, C, C)    3x3 conv weight, HWIO
    bconv_ref : (1, C)
    whead_ref : (C, 5A)         fused [objectness | anchor_deltas] 1x1 weight
    bhead_ref : (1, 5A)
    cls_ref   : (1, A, TH*W)    channel-first, spatially flattened
    del_ref   : (1, 4A, TH*W)
    *_slab    : (TH+2, W, C)    VMEM scratch: the three kx-shifted row slabs
    """
    TH = xm_ref.shape[1]
    W = xm_ref.shape[2]
    C = xm_ref.shape[3]
    A = cls_ref.shape[1]
    M = TH * W

    i = pl.program_id(1)
    last = pl.num_programs(1) - 1
    top_scale = (i > 0).astype(jnp.float32)     # zero padding at the image top
    bot_scale = (i < last).astype(jnp.float32)  # zero padding at the image bottom

    # ---- assemble the (TH+2, W, C) row slab for the centre tap (kx = 1) -----
    mid_slab[0, :, :] = xt_ref[0, 0] * top_scale
    mid_slab[1:TH + 1, :, :] = xm_ref[0]
    mid_slab[TH + 1, :, :] = xb_ref[0, 0] * bot_scale
    mid = mid_slab[...]

    # ---- hoisted kx shifts: 2 sublane-shift copies instead of 9 -------------
    zcol = jnp.zeros((TH + 2, 1, C), jnp.float32)
    left_slab[:, 1:, :] = mid[:, :W - 1, :]     # column x holds input column x-1
    left_slab[:, 0:1, :] = zcol
    right_slab[:, :W - 1, :] = mid[:, 1:, :]    # column x holds input column x+1
    right_slab[:, W - 1:, :] = zcol

    # ---- 3x3 conv: 9 (TH*W, C) @ (C, C) MXU matmuls; ky slices the free
    #      leading row axis of each slab (no relayout) ------------------------
    acc = jnp.zeros((M, C), jnp.float32)
    for kx, slab in enumerate((left_slab, mid_slab, right_slab)):
        for ky in range(3):
            patch = slab[ky:ky + TH].reshape(M, C)
            acc = acc + jnp.dot(patch, wconv_ref[ky, kx],
                                preferred_element_type=jnp.float32)
    t = jnp.maximum(acc + bconv_ref[0], 0.0)    # bias + ReLU

    # ---- fused 1x1 heads: one (TH*W, C) @ (C, 5A) matmul ---------------------
    head = jnp.dot(t, whead_ref[...],
                   preferred_element_type=jnp.float32) + bhead_ref[0]

    # ---- channel-first, lane-dense store (last dim = TH*W) -------------------
    head_cf = head.T                            # (5A, TH*W), small XLU transpose
    cls_ref[0] = head_cf[:A].astype(cls_ref.dtype)
    del_ref[0] = head_cf[A:].astype(del_ref.dtype)


def rpn_head_level(x_nchw, params, tile_rows=8):
    """RPNHead on one feature level.  x_nchw: (N, C, H, W) float32 (PyTorch layout)."""
    wconv, bconv, wcls, bcls, wdel, bdel = params
    N, C, H, W = x_nchw.shape
    A = wcls.shape[1]
    D = wdel.shape[1]

    # Row-tile size: TH rows per grid step (+1 halo row each side).
    # Constraints: TH | H, and the flattened output block TH*W must be a
    # multiple of 128 lanes or the whole image.  Fall back to whole-image.
    TH = min(tile_rows, H)
    if H % TH or ((TH * W) % 128 and TH != H):
        TH = H
    n_row_tiles = H // TH

    # Fuse the two 1x1 heads into one matmul weight.
    whead = jnp.concatenate([wcls, wdel], axis=1)          # (C, A + 4A)
    bhead = jnp.concatenate([bcls, bdel], axis=1)          # (1, A + 4A)

    # NCHW -> NHWC so channels sit on the lane axis for the MXU contractions.
    # TODO(synk): drop this transpose if the surrounding model keeps NHWC.
    x = jnp.transpose(x_nchw, (0, 2, 3, 1))

    rep = lambda shape: pl.BlockSpec(shape, lambda n, i: (0,) * len(shape))

    cls_flat, del_flat = pl.pallas_call(
        _rpn_head_kernel,
        out_shape=(jax.ShapeDtypeStruct((N, A, H * W), jnp.float32),
                   jax.ShapeDtypeStruct((N, D, H * W), jnp.float32)),
        grid_spec=pltpu.PrefetchScalarGridSpec(
            num_scalar_prefetch=0,
            grid=(N, n_row_tiles),
            in_specs=[
                # 1-row top halo, clamped at the border (zeroed in-kernel)
                pl.BlockSpec((1, 1, W, C),
                             lambda n, i: (n, jnp.maximum(i * TH - 1, 0), 0, 0)),
                # main TH-row tile
                pl.BlockSpec((1, TH, W, C), lambda n, i: (n, i, 0, 0)),
                # 1-row bottom halo, clamped at the border
                pl.BlockSpec((1, 1, W, C),
                             lambda n, i: (n, jnp.minimum(i * TH + TH, H - 1), 0, 0)),
                rep((3, 3, C, C)),
                rep((1, C)),
                rep((C, A + D)),
                rep((1, A + D)),
            ],
            out_specs=[
                pl.BlockSpec((1, A, TH * W), lambda n, i: (n, 0, i)),
                pl.BlockSpec((1, D, TH * W), lambda n, i: (n, 0, i)),
            ],
            scratch_shapes=[pltpu.VMEM((TH + 2, W, C), jnp.float32)
                            for _ in range(3)],
        ),
        compiler_params=pltpu.CompilerParams(
            dimension_semantics=("parallel", "parallel"),
            vmem_limit_bytes=64 * 1024 * 1024),
    )(x, x, x, wconv, bconv, whead, bhead)

    # Free (metadata-only) reshapes back to PyTorch's NCHW output convention.
    return cls_flat.reshape(N, A, H, W), del_flat.reshape(N, D, H, W)


def rpn_forward(features, params):
    """RPN.forward numeric path: returns (rpn_cls_score, rpn_bbox_pred) lists."""
    rpn_cls_score, rpn_bbox_pred = [], []
    for x in features:
        cls, dlt = rpn_head_level(x, params)
        rpn_cls_score.append(cls)
        rpn_bbox_pred.append(dlt)
    return rpn_cls_score, rpn_bbox_pred


def init_params(key, in_channels, num_anchors, box_dim=4):
    """Weights mirroring RPNHead.__init__ (normal std=0.01).  RPNHead sets the
    biases to 0; small nonzero biases are used here so the bias path is
    actually exercised by the numeric check."""
    k1, k2, k3, k4, k5, k6 = jax.random.split(key, 6)
    # PyTorch layouts: conv weight (Cout, Cin, kh, kw)
    wconv_pt = 0.01 * jax.random.normal(k1, (in_channels, in_channels, 3, 3), jnp.float32)
    wcls_pt = 0.01 * jax.random.normal(k2, (num_anchors, in_channels, 1, 1), jnp.float32)
    wdel_pt = 0.01 * jax.random.normal(k3, (box_dim * num_anchors, in_channels, 1, 1), jnp.float32)

    wconv = jnp.transpose(wconv_pt, (2, 3, 1, 0))              # HWIO (3,3,Cin,Cout)
    wcls = jnp.transpose(wcls_pt[:, :, 0, 0], (1, 0))          # (Cin, A)
    wdel = jnp.transpose(wdel_pt[:, :, 0, 0], (1, 0))          # (Cin, 4A)
    bconv = 0.05 * jax.random.normal(k4, (1, in_channels), jnp.float32)
    bcls = 0.05 * jax.random.normal(k5, (1, num_anchors), jnp.float32)
    bdel = 0.05 * jax.random.normal(k6, (1, box_dim * num_anchors), jnp.float32)
    return (wconv, bconv, wcls, bcls, wdel, bdel)


def _reference_level(x_nchw, params):
    """Pure-JAX reference (lax convs) for correctness checking."""
    wconv, bconv, wcls, bcls, wdel, bdel = params
    x = jnp.transpose(x_nchw, (0, 2, 3, 1))
    dn = ('NHWC', 'HWIO', 'NHWC')
    t = lax.conv_general_dilated(x, wconv, (1, 1), 'SAME', dimension_numbers=dn)
    t = jnp.maximum(t + bconv[0], 0.0)
    cls = lax.conv_general_dilated(t, wcls[None, None], (1, 1), 'SAME',
                                   dimension_numbers=dn) + bcls[0]
    dlt = lax.conv_general_dilated(t, wdel[None, None], (1, 1), 'SAME',
                                   dimension_numbers=dn) + bdel[0]
    return (jnp.transpose(cls, (0, 3, 1, 2)), jnp.transpose(dlt, (0, 3, 1, 2)))


if __name__ == "__main__":
    key = jax.random.PRNGKey(0)
    kp, kx1, kx2 = jax.random.split(key, 3)

    in_channels = 8
    num_anchors = 3
    box_dim = 4
    params = init_params(kp, in_channels, num_anchors, box_dim)

    # Two FPN-style feature levels, NCHW (PyTorch convention).
    feats = [
        jax.random.normal(kx1, (2, in_channels, 16, 16), jnp.float32),
        jax.random.normal(kx2, (2, in_channels, 8, 8), jnp.float32),
    ]

    cls_scores, bbox_preds = rpn_forward(feats, params)
    cls_scores = [jax.block_until_ready(c) for c in cls_scores]
    bbox_preds = [jax.block_until_ready(d) for d in bbox_preds]

    # Correctness check vs pure-JAX reference.
    for x, c, d in zip(feats, cls_scores, bbox_preds):
        rc, rd = _reference_level(x, params)
        assert c.shape == rc.shape and d.shape == rd.shape
        assert jnp.allclose(c, rc, atol=1e-5, rtol=1e-5)
        assert jnp.allclose(d, rd, atol=1e-5, rtol=1e-5)

    print("KERNEL_OK")
</pallas_src>

<mosaic_0001>
module attributes {stable_mosaic.version = 11 : i64} {
  func.func @_rpn_head_kernel(%arg0: i32, %arg1: i32, %arg2: memref<1x1x16x8xf32, #tpu.memory_space<vmem>>, %arg3: memref<1x8x16x8xf32, #tpu.memory_space<vmem>>, %arg4: memref<1x1x16x8xf32, #tpu.memory_space<vmem>>, %arg5: memref<3x3x8x8xf32, #tpu.memory_space<vmem>>, %arg6: memref<1x8xf32, #tpu.memory_space<vmem>>, %arg7: memref<8x15xf32, #tpu.memory_space<vmem>>, %arg8: memref<1x15xf32, #tpu.memory_space<vmem>>, %arg9: memref<1x3x128xf32, #tpu.memory_space<vmem>>, %arg10: memref<1x12x128xf32, #tpu.memory_space<vmem>>, %arg11: memref<10x16x8xf32, #tpu.memory_space<vmem>>, %arg12: memref<10x16x8xf32, #tpu.memory_space<vmem>>, %arg13: memref<10x16x8xf32, #tpu.memory_space<vmem>>) attributes {dimension_semantics = [#tpu.dimension_semantics<parallel>, #tpu.dimension_semantics<parallel>], iteration_bounds = array<i64: 2, 2>, scalar_prefetch = 0 : i64, scratch_operands = 3 : i64, tpu.core_type = #tpu.core_type<tc>, window_params = [{transform_indices = @transform_0, window_bounds = array<i64: 1, 1, 16, 8>}, {transform_indices = @transform_1, window_bounds = array<i64: 1, 8, 16, 8>}, {transform_indices = @transform_2, window_bounds = array<i64: 1, 1, 16, 8>}, {pipeline_mode = #tpu.pipeline_mode<synchronous>, transform_indices = @transform_3, window_bounds = array<i64: 3, 3, 8, 8>}, {pipeline_mode = #tpu.pipeline_mode<synchronous>, transform_indices = @transform_4, window_bounds = array<i64: 1, 8>}, {pipeline_mode = #tpu.pipeline_mode<synchronous>, transform_indices = @transform_5, window_bounds = array<i64: 8, 15>}, {pipeline_mode = #tpu.pipeline_mode<synchronous>, transform_indices = @transform_6, window_bounds = array<i64: 1, 15>}, {transform_indices = @transform_7, window_bounds = array<i64: 1, 3, 128>}, {transform_indices = @transform_8, window_bounds = array<i64: 1, 12, 128>}]} {
    %c0_i32 = arith.constant 0 : i32
    %0 = arith.cmpi sgt, %arg1, %c0_i32 : i32
    %1 = arith.extui %0 : i1 to i32
    %2 = arith.sitofp %1 : i32 to f32
    %c1_i32 = arith.constant 1 : i32
    %3 = arith.cmpi slt, %arg1, %c1_i32 : i32
    %4 = arith.extui %3 : i1 to i32
    %5 = arith.sitofp %4 : i32 to f32
    %c0 = arith.constant 0 : index
    %c0_0 = arith.constant 0 : index
    %c0_1 = arith.constant 0 : index
    %c0_2 = arith.constant 0 : index
    %6 = vector.load %arg2[%c0, %c0_0, %c0_1, %c0_2] : memref<1x1x16x8xf32, #tpu.memory_space<vmem>>, vector<1x1x16x8xf32>
    %7 = vector.shape_cast %6 : vector<1x1x16x8xf32> to vector<16x8xf32>
    %8 = vector.broadcast %2 : f32 to vector<16x8xf32>
    %9 = arith.mulf %7, %8 : vector<16x8xf32>
    %c0_3 = arith.constant 0 : index
    %c0_4 = arith.constant 0 : index
    %c0_5 = arith.constant 0 : index
    %10 = vector.load %arg11[%c0_3, %c0_4, %c0_5] : memref<10x16x8xf32, #tpu.memory_space<vmem>>, vector<1x16x8xf32>
    %11 = vector.shape_cast %10 : vector<1x16x8xf32> to vector<16x8xf32>
    %12 = vector.shape_cast %9 : vector<16x8xf32> to vector<1x16x8xf32>
    tpu.vector_store %arg11[%c0_3, %c0_4, %c0_5], %12 {strides = array<i32>} : memref<10x16x8xf32, #tpu.memory_space<vmem>>, vector<1x16x8xf32>,
    %c0_6 = arith.constant 0 : index
    %c0_7 = arith.constant 0 : index
    %c0_8 = arith.constant 0 : index
    %c0_9 = arith.constant 0 : index
    %13 = vector.load %arg3[%c0_6, %c0_7, %c0_8, %c0_9] : memref<1x8x16x8xf32, #tpu.memory_space<vmem>>, vector<1x8x16x8xf32>
    %14 = vector.shape_cast %13 : vector<1x8x16x8xf32> to vector<8x16x8xf32>
    %c1 = arith.constant 1 : index
    %c0_10 = arith.constant 0 : index
    %c0_11 = arith.constant 0 : index
    %15 = vector.load %arg11[%c1, %c0_10, %c0_11] : memref<10x16x8xf32, #tpu.memory_space<vmem>>, vector<8x16x8xf32>
    tpu.vector_store %arg11[%c1, %c0_10, %c0_11], %14 {strides = array<i32>} : memref<10x16x8xf32, #tpu.memory_space<vmem>>, vector<8x16x8xf32>,
    %c0_12 = arith.constant 0 : index
    %c0_13 = arith.constant 0 : index
    %c0_14 = arith.constant 0 : index
    %c0_15 = arith.constant 0 : index
    %16 = vector.load %arg4[%c0_12, %c0_13, %c0_14, %c0_15] : memref<1x1x16x8xf32, #tpu.memory_space<vmem>>, vector<1x1x16x8xf32>
    %17 = vector.shape_cast %16 : vector<1x1x16x8xf32> to vector<16x8xf32>
    %18 = vector.broadcast %5 : f32 to vector<16x8xf32>
    %19 = arith.mulf %17, %18 : vector<16x8xf32>
    %c9 = arith.constant 9 : index
    %c0_16 = arith.constant 0 : index
    %c0_17 = arith.constant 0 : index
    %20 = vector.load %arg11[%c9, %c0_16, %c0_17] : memref<10x16x8xf32, #tpu.memory_space<vmem>>, vector<1x16x8xf32>
    %21 = vector.shape_cast %20 : vector<1x16x8xf32> to vector<16x8xf32>
    %22 = vector.shape_cast %19 : vector<16x8xf32> to vector<1x16x8xf32>
    tpu.vector_store %arg11[%c9, %c0_16, %c0_17], %22 {strides = array<i32>} : memref<10x16x8xf32, #tpu.memory_space<vmem>>, vector<1x16x8xf32>,
    %c0_18 = arith.constant 0 : index
    %c0_19 = arith.constant 0 : index
    %c0_20 = arith.constant 0 : index
    %23 = vector.load %arg11[%c0_18, %c0_19, %c0_20] : memref<10x16x8xf32, #tpu.memory_space<vmem>>, vector<10x16x8xf32>
    %cst = arith.constant 0.000000e+00 : f32
    %24 = vector.broadcast %cst : f32 to vector<10x1x8xf32>
    %25 = vector.extract_strided_slice %23 {offsets = [0, 0, 0], sizes = [10, 15, 8], strides = [1, 1, 1]} : vector<10x16x8xf32> to vector<10x15x8xf32>
    %c0_21 = arith.constant 0 : index
    %c1_22 = arith.constant 1 : index
    %c0_23 = arith.constant 0 : index
    %26 = vector.load %arg12[%c0_21, %c1_22, %c0_23] : memref<10x16x8xf32, #tpu.memory_space<vmem>>, vector<10x15x8xf32>
    tpu.vector_store %arg12[%c0_21, %c1_22, %c0_23], %25 {strides = array<i32>} : memref<10x16x8xf32, #tpu.memory_space<vmem>>, vector<10x15x8xf32>,
    %c0_24 = arith.constant 0 : index
    %c0_25 = arith.constant 0 : index
    %c0_26 = arith.constant 0 : index
    %27 = vector.load %arg12[%c0_24, %c0_25, %c0_26] : memref<10x16x8xf32, #tpu.memory_space<vmem>>, vector<10x1x8xf32>
    tpu.vector_store %arg12[%c0_24, %c0_25, %c0_26], %24 {strides = array<i32>} : memref<10x16x8xf32, #tpu.memory_space<vmem>>, vector<10x1x8xf32>,
    %28 = vector.extract_strided_slice %23 {offsets = [0, 1, 0], sizes = [10, 15, 8], strides = [1, 1, 1]} : vector<10x16x8xf32> to vector<10x15x8xf32>
    %c0_27 = arith.constant 0 : index
    %c0_28 = arith.constant 0 : index
    %c0_29 = arith.constant 0 : index
    %29 = vector.load %arg13[%c0_27, %c0_28, %c0_29] : memref<10x16x8xf32, #tpu.memory_space<vmem>>, vector<10x15x8xf32>
    tpu.vector_store %arg13[%c0_27, %c0_28, %c0_29], %28 {strides = array<i32>} : memref<10x16x8xf32, #tpu.memory_space<vmem>>, vector<10x15x8xf32>,
    %c0_30 = arith.constant 0 : index
    %c15 = arith.constant 15 : index
    %c0_31 = arith.constant 0 : index
    %30 = vector.load %arg13[%c0_30, %c15, %c0_31] : memref<10x16x8xf32, #tpu.memory_space<vmem>>, vector<10x1x8xf32>
    tpu.vector_store %arg13[%c0_30, %c15, %c0_31], %24 {strides = array<i32>} : memref<10x16x8xf32, #tpu.memory_space<vmem>>, vector<10x1x8xf32>,
    %cst_32 = arith.constant 0.000000e+00 : f32
    %31 = vector.broadcast %cst_32 : f32 to vector<128x8xf32>
    %c0_33 = arith.constant 0 : index
    %c0_34 = arith.constant 0 : index
    %c0_35 = arith.constant 0 : index
    %32 = vector.load %arg12[%c0_33, %c0_34, %c0_35] : memref<10x16x8xf32, #tpu.memory_space<vmem>>, vector<8x16x8xf32>
    %33 = vector.shape_cast %32 : vector<8x16x8xf32> to vector<128x8xf32>
    %c0_36 = arith.constant 0 : index
    %c0_37 = arith.constant 0 : index
    %c0_38 = arith.constant 0 : index
    %c0_39 = arith.constant 0 : index
    %34 = vector.load %arg5[%c0_36, %c0_37, %c0_38, %c0_39] : memref<3x3x8x8xf32, #tpu.memory_space<vmem>>, vector<1x1x8x8xf32>
    %35 = vector.shape_cast %34 : vector<1x1x8x8xf32> to vector<8x8xf32>
    %cst_40 = arith.constant dense<0.000000e+00> : vector<128x8xf32>
    %36 = tpu.matmul %33, %35, %cst_40 {dimension_numbers = #tpu.dot_dimension_numbers<[1], [0], [0], [1], [0, 0, 1, 1], [], []>} : vector<128x8xf32>, vector<8x8xf32>, vector<128x8xf32> -> vector<128x8xf32>
    %37 = arith.addf %31, %36 : vector<128x8xf32>
    %c1_41 = arith.constant 1 : index
    %c0_42 = arith.constant 0 : index
    %c0_43 = arith.constant 0 : index
    %38 = vector.load %arg12[%c1_41, %c0_42, %c0_43] : memref<10x16x8xf32, #tpu.memory_space<vmem>>, vector<8x16x8xf32>
    %39 = vector.shape_cast %38 : vector<8x16x8xf32> to vector<128x8xf32>
    %c1_44 = arith.constant 1 : index
    %c0_45 = arith.constant 0 : index
    %c0_46 = arith.constant 0 : index
    %c0_47 = arith.constant 0 : index
    %40 = vector.load %arg5[%c1_44, %c0_45, %c0_46, %c0_47] : memref<3x3x8x8xf32, #tpu.memory_space<vmem>>, vector<1x1x8x8xf32>
    %41 = vector.shape_cast %40 : vector<1x1x8x8xf32> to vector<8x8xf32>
    %cst_48 = arith.constant dense<0.000000e+00> : vector<128x8xf32>
    %42 = tpu.matmul %39, %41, %cst_48 {dimension_numbers = #tpu.dot_dimension_numbers<[1], [0], [0], [1], [0, 0, 1, 1], [], []>} : vector<128x8xf32>, vector<8x8xf32>, vector<128x8xf32> -> vector<128x8xf32>
    %43 = arith.addf %37, %42 : vector<128x8xf32>
    %c2 = arith.constant 2 : index
    %c0_49 = arith.constant 0 : index
    %c0_50 = arith.constant 0 : index
    %44 = vector.load %arg12[%c2, %c0_49, %c0_50] : memref<10x16x8xf32, #tpu.memory_space<vmem>>, vector<8x16x8xf32>
    %45 = vector.shape_cast %44 : vector<8x16x8xf32> to vector<128x8xf32>
    %c2_51 = arith.constant 2 : index
    %c0_52 = arith.constant 0 : index
    %c0_53 = arith.constant 0 : index
    %c0_54 = arith.constant 0 : index
    %46 = vector.load %arg5[%c2_51, %c0_52, %c0_53, %c0_54] : memref<3x3x8x8xf32, #tpu.memory_space<vmem>>, vector<1x1x8x8xf32>
    %47 = vector.shape_cast %46 : vector<1x1x8x8xf32> to vector<8x8xf32>
    %cst_55 = arith.constant dense<0.000000e+00> : vector<128x8xf32>
    %48 = tpu.matmul %45, %47, %cst_55 {dimension_numbers = #tpu.dot_dimension_numbers<[1], [0], [0], [1], [0, 0, 1, 1], [], []>} : vector<128x8xf32>, vector<8x8xf32>, vector<128x8xf32> -> vector<128x8xf32>
    %49 = arith.addf %43, %48 : vector<128x8xf32>
    %c0_56 = arith.constant 0 : index
    %c0_57 = arith.constant 0 : index
    %c0_58 = arith.constant 0 : index
    %50 = vector.load %arg11[%c0_56, %c0_57, %c0_58] : memref<10x16x8xf32, #tpu.memory_space<vmem>>, vector<8x16x8xf32>
    %51 = vector.shape_cast %50 : vector<8x16x8xf32> to vector<128x8xf32>
    %c0_59 = arith.constant 0 : index
    %c1_60 = arith.constant 1 : index
    %c0_61 = arith.constant 0 : index
    %c0_62 = arith.constant 0 : index
    %52 = vector.load %arg5[%c0_59, %c1_60, %c0_61, %c0_62] : memref<3x3x8x8xf32, #tpu.memory_space<vmem>>, vector<1x1x8x8xf32>
    %53 = vector.shape_cast %52 : vector<1x1x8x8xf32> to vector<8x8xf32>
    %cst_63 = arith.constant dense<0.000000e+00> : vector<128x8xf32>
    %54 = tpu.matmul %51, %53, %cst_63 {dimension_numbers = #tpu.dot_dimension_numbers<[1], [0], [0], [1], [0, 0, 1, 1], [], []>} : vector<128x8xf32>, vector<8x8xf32>, vector<128x8xf32> -> vector<128x8xf32>
    %55 = arith.addf %49, %54 : vector<128x8xf32>
    %c1_64 = arith.constant 1 : index
    %c0_65 = arith.constant 0 : index
    %c0_66 = arith.constant 0 : index
    %56 = vector.load %arg11[%c1_64, %c0_65, %c0_66] : memref<10x16x8xf32, #tpu.memory_space<vmem>>, vector<8x16x8xf32>
    %57 = vector.shape_cast %56 : vector<8x16x8xf32> to vector<128x8xf32>
    %c1_67 = arith.constant 1 : index
    %c1_68 = arith.constant 1 : index
    %c0_69 = arith.constant 0 : index
    %c0_70 = arith.constant 0 : index
    %58 = vector.load %arg5[%c1_67, %c1_68, %c0_69, %c0_70] : memref<3x3x8x8xf32, #tpu.memory_space<vmem>>, vector<1x1x8x8xf32>
    %59 = vector.shape_cast %58 : vector<1x1x8x8xf32> to vector<8x8xf32>
    %cst_71 = arith.constant dense<0.000000e+00> : vector<128x8xf32>
    %60 = tpu.matmul %57, %59, %cst_71 {dimension_numbers = #tpu.dot_dimension_numbers<[1], [0], [0], [1], [0, 0, 1, 1], [], []>} : vector<128x8xf32>, vector<8x8xf32>, vector<128x8xf32> -> vector<128x8xf32>
    %61 = arith.addf %55, %60 : vector<128x8xf32>
    %c2_72 = arith.constant 2 : index
    %c0_73 = arith.constant 0 : index
    %c0_74 = arith.constant 0 : index
    %62 = vector.load %arg11[%c2_72, %c0_73, %c0_74] : memref<10x16x8xf32, #tpu.memory_space<vmem>>, vector<8x16x8xf32>
    %63 = vector.shape_cast %62 : vector<8x16x8xf32> to vector<128x8xf32>
    %c2_75 = arith.constant 2 : index
    %c1_76 = arith.constant 1 : index
    %c0_77 = arith.constant 0 : index
    %c0_78 = arith.constant 0 : index
    %64 = vector.load %arg5[%c2_75, %c1_76, %c0_77, %c0_78] : memref<3x3x8x8xf32, #tpu.memory_space<vmem>>, vector<1x1x8x8xf32>
    %65 = vector.shape_cast %64 : vector<1x1x8x8xf32> to vector<8x8xf32>
    %cst_79 = arith.constant dense<0.000000e+00> : vector<128x8xf32>
    %66 = tpu.matmul %63, %65, %cst_79 {dimension_numbers = #tpu.dot_dimension_numbers<[1], [0], [0], [1], [0, 0, 1, 1], [], []>} : vector<128x8xf32>, vector<8x8xf32>, vector<128x8xf32> -> vector<128x8xf32>
    %67 = arith.addf %61, %66 : vector<128x8xf32>
    %c0_80 = arith.constant 0 : index
    %c0_81 = arith.constant 0 : index
    %c0_82 = arith.constant 0 : index
    %68 = vector.load %arg13[%c0_80, %c0_81, %c0_82] : memref<10x16x8xf32, #tpu.memory_space<vmem>>, vector<8x16x8xf32>
    %69 = vector.shape_cast %68 : vector<8x16x8xf32> to vector<128x8xf32>
    %c0_83 = arith.constant 0 : index
    %c2_84 = arith.constant 2 : index
    %c0_85 = arith.constant 0 : index
    %c0_86 = arith.constant 0 : index
    %70 = vector.load %arg5[%c0_83, %c2_84, %c0_85, %c0_86] : memref<3x3x8x8xf32, #tpu.memory_space<vmem>>, vector<1x1x8x8xf32>
    %71 = vector.shape_cast %70 : vector<1x1x8x8xf32> to vector<8x8xf32>
    %cst_87 = arith.constant dense<0.000000e+00> : vector<128x8xf32>
    %72 = tpu.matmul %69, %71, %cst_87 {dimension_numbers = #tpu.dot_dimension_numbers<[1], [0], [0], [1], [0, 0, 1, 1], [], []>} : vector<128x8xf32>, vector<8x8xf32>, vector<128x8xf32> -> vector<128x8xf32>
    %73 = arith.addf %67, %72 : vector<128x8xf32>
    %c1_88 = arith.constant 1 : index
    %c0_89 = arith.constant 0 : index
    %c0_90 = arith.constant 0 : index
    %74 = vector.load %arg13[%c1_88, %c0_89, %c0_90] : memref<10x16x8xf32, #tpu.memory_space<vmem>>, vector<8x16x8xf32>
    %75 = vector.shape_cast %74 : vector<8x16x8xf32> to vector<128x8xf32>
    %c1_91 = arith.constant 1 : index
    %c2_92 = arith.constant 2 : index
    %c0_93 = arith.constant 0 : index
    %c0_94 = arith.constant 0 : index
    %76 = vector.load %arg5[%c1_91, %c2_92, %c0_93, %c0_94] : memref<3x3x8x8xf32, #tpu.memory_space<vmem>>, vector<1x1x8x8xf32>
    %77 = vector.shape_cast %76 : vector<1x1x8x8xf32> to vector<8x8xf32>
    %cst_95 = arith.constant dense<0.000000e+00> : vector<128x8xf32>
    %78 = tpu.matmul %75, %77, %cst_95 {dimension_numbers = #tpu.dot_dimension_numbers<[1], [0], [0], [1], [0, 0, 1, 1], [], []>} : vector<128x8xf32>, vector<8x8xf32>, vector<128x8xf32> -> vector<128x8xf32>
    %79 = arith.addf %73, %78 : vector<128x8xf32>
    %c2_96 = arith.constant 2 : index
    %c0_97 = arith.constant 0 : index
    %c0_98 = arith.constant 0 : index
    %80 = vector.load %arg13[%c2_96, %c0_97, %c0_98] : memref<10x16x8xf32, #tpu.memory_space<vmem>>, vector<8x16x8xf32>
    %81 = vector.shape_cast %80 : vector<8x16x8xf32> to vector<128x8xf32>
    %c2_99 = arith.constant 2 : index
    %c2_100 = arith.constant 2 : index
    %c0_101 = arith.constant 0 : index
    %c0_102 = arith.constant 0 : index
    %82 = vector.load %arg5[%c2_99, %c2_100, %c0_101, %c0_102] : memref<3x3x8x8xf32, #tpu.memory_space<vmem>>, vector<1x1x8x8xf32>
    %83 = vector.shape_cast %82 : vector<1x1x8x8xf32> to vector<8x8xf32>
    %cst_103 = arith.constant dense<0.000000e+00> : vector<128x8xf32>
    %84 = tpu.matmul %81, %83, %cst_103 {dimension_numbers = #tpu.dot_dimension_numbers<[1], [0], [0], [1], [0, 0, 1, 1], [], []>} : vector<128x8xf32>, vector<8x8xf32>, vector<128x8xf32> -> vector<128x8xf32>
    %85 = arith.addf %79, %84 : vector<128x8xf32>
    %c0_104 = arith.constant 0 : index
    %c0_105 = arith.constant 0 : index
    %86 = vector.load %arg6[%c0_104, %c0_105] : memref<1x8xf32, #tpu.memory_space<vmem>>, vector<1x8xf32>
    %87 = vector.shape_cast %86 : vector<1x8xf32> to vector<8xf32>
    %88 = vector.shape_cast %87 : vector<8xf32> to vector<1x8xf32>
    %89 = vector.broadcast %88 : vector<1x8xf32> to vector<128x8xf32>
    %90 = arith.addf %85, %89 : vector<128x8xf32>
    %cst_106 = arith.constant 0.000000e+00 : f32
    %91 = vector.broadcast %cst_106 : f32 to vector<128x8xf32>
    %92 = arith.maximumf %90, %91 : vector<128x8xf32>
    %c0_107 = arith.constant 0 : index
    %c0_108 = arith.constant 0 : index
    %93 = vector.load %arg7[%c0_107, %c0_108] : memref<8x15xf32, #tpu.memory_space<vmem>>, vector<8x15xf32>
    %cst_109 = arith.constant dense<0.000000e+00> : vector<128x15xf32>
    %94 = tpu.matmul %92, %93, %cst_109 {dimension_numbers = #tpu.dot_dimension_numbers<[1], [0], [0], [1], [0, 0, 1, 1], [], []>} : vector<128x8xf32>, vector<8x15xf32>, vector<128x15xf32> -> vector<128x15xf32>
    %c0_110 = arith.constant 0 : index
    %c0_111 = arith.constant 0 : index
    %95 = vector.load %arg8[%c0_110, %c0_111] : memref<1x15xf32, #tpu.memory_space<vmem>>, vector<1x15xf32>
    %96 = vector.shape_cast %95 : vector<1x15xf32> to vector<15xf32>
    %97 = vector.shape_cast %96 : vector<15xf32> to vector<1x15xf32>
    %98 = vector.broadcast %97 : vector<1x15xf32> to vector<128x15xf32>
    %99 = arith.addf %94, %98 : vector<128x15xf32>
    %100 = tpu.transpose %99, [1, 0] : vector<128x15xf32> -> vector<15x128xf32>
    %101 = vector.extract_strided_slice %100 {offsets = [0, 0], sizes = [3, 128], strides = [1, 1]} : vector<15x128xf32> to vector<3x128xf32>
    %c0_112 = arith.constant 0 : index
    %c0_113 = arith.constant 0 : index
    %c0_114 = arith.constant 0 : index
    %102 = vector.load %arg9[%c0_112, %c0_113, %c0_114] : memref<1x3x128xf32, #tpu.memory_space<vmem>>, vector<1x3x128xf32>
    %103 = vector.shape_cast %102 : vector<1x3x128xf32> to vector<3x128xf32>
    %104 = vector.shape_cast %101 : vector<3x128xf32> to vector<1x3x128xf32>
    tpu.vector_store %arg9[%c0_112, %c0_113, %c0_114], %104 {strides = array<i32>} : memref<1x3x128xf32, #tpu.memory_space<vmem>>, vector<1x3x128xf32>,
    %105 = vector.extract_strided_slice %100 {offsets = [3, 0], sizes = [12, 128], strides = [1, 1]} : vector<15x128xf32> to vector<12x128xf32>
    %c0_115 = arith.constant 0 : index
    %c0_116 = arith.constant 0 : index
    %c0_117 = arith.constant 0 : index
    %106 = vector.load %arg10[%c0_115, %c0_116, %c0_117] : memref<1x12x128xf32, #tpu.memory_space<vmem>>, vector<1x12x128xf32>
    %107 = vector.shape_cast %106 : vector<1x12x128xf32> to vector<12x128xf32>
    %108 = vector.shape_cast %105 : vector<12x128xf32> to vector<1x12x128xf32>
    tpu.vector_store %arg10[%c0_115, %c0_116, %c0_117], %108 {strides = array<i32>} : memref<1x12x128xf32, #tpu.memory_space<vmem>>, vector<1x12x128xf32>,
    return
  }
  func.func @transform_0(%arg0: i32, %arg1: i32) -> (i32, i32, i32, i32) {
    %c8_i32 = arith.constant 8 : i32
    %0 = arith.muli %arg1, %c8_i32 : i32
    %c1_i32 = arith.constant 1 : i32
    %1 = arith.subi %0, %c1_i32 : i32
    %c0_i32 = arith.constant 0 : i32
    %2 = arith.maxsi %1, %c0_i32 : i32
    %c0_i32_0 = arith.constant 0 : i32
    %c0_i32_1 = arith.constant 0 : i32
    %c0_i32_2 = arith.constant 0 : i32
    return %arg0, %2, %c0_i32_0, %c0_i32_1 : i32, i32, i32, i32
  }
  func.func @transform_1(%arg0: i32, %arg1: i32) -> (i32, i32, i32, i32) {
    %c0_i32 = arith.constant 0 : i32
    %c0_i32_0 = arith.constant 0 : i32
    %c0_i32_1 = arith.constant 0 : i32
    return %arg0, %arg1, %c0_i32, %c0_i32_0 : i32, i32, i32, i32
  }
  func.func @transform_2(%arg0: i32, %arg1: i32) -> (i32, i32, i32, i32) {
    %c8_i32 = arith.constant 8 : i32
    %0 = arith.muli %arg1, %c8_i32 : i32
    %c8_i32_0 = arith.constant 8 : i32
    %1 = arith.addi %0, %c8_i32_0 : i32
    %c15_i32 = arith.constant 15 : i32
    %2 = arith.minsi %1, %c15_i32 : i32
    %c0_i32 = arith.constant 0 : i32
    %c0_i32_1 = arith.constant 0 : i32
    %c0_i32_2 = arith.constant 0 : i32
    return %arg0, %2, %c0_i32, %c0_i32_1 : i32, i32, i32, i32
  }
  func.func @transform_3(%arg0: i32, %arg1: i32) -> (i32, i32, i32, i32) {
    %c0_i32 = arith.constant 0 : i32
    %c0_i32_0 = arith.constant 0 : i32
    %c0_i32_1 = arith.constant 0 : i32
    %c0_i32_2 = arith.constant 0 : i32
    %c0_i32_3 = arith.constant 0 : i32
    return %c0_i32, %c0_i32_0, %c0_i32_1, %c0_i32_2 : i32, i32, i32, i32
  }
  func.func @transform_4(%arg0: i32, %arg1: i32) -> (i32, i32) {
    %c0_i32 = arith.constant 0 : i32
    %c0_i32_0 = arith.constant 0 : i32
    %c0_i32_1 = arith.constant 0 : i32
    return %c0_i32, %c0_i32_0 : i32, i32
  }
  func.func @transform_5(%arg0: i32, %arg1: i32) -> (i32, i32) {
    %c0_i32 = arith.constant 0 : i32
    %c0_i32_0 = arith.constant 0 : i32
    %c0_i32_1 = arith.constant 0 : i32
    return %c0_i32, %c0_i32_0 : i32, i32
  }
  func.func @transform_6(%arg0: i32, %arg1: i32) -> (i32, i32) {
    %c0_i32 = arith.constant 0 : i32
    %c0_i32_0 = arith.constant 0 : i32
    %c0_i32_1 = arith.constant 0 : i32
    return %c0_i32, %c0_i32_0 : i32, i32
  }
  func.func @transform_7(%arg0: i32, %arg1: i32) -> (i32, i32, i32) {
    %c0_i32 = arith.constant 0 : i32
    %c0_i32_0 = arith.constant 0 : i32
    return %arg0, %c0_i32, %arg1 : i32, i32, i32
  }
  func.func @transform_8(%arg0: i32, %arg1: i32) -> (i32, i32, i32) {
    %c0_i32 = arith.constant 0 : i32
    %c0_i32_0 = arith.constant 0 : i32
    return %arg0, %c0_i32, %arg1 : i32, i32, i32
  }
}

</mosaic_0001>

<bundles_post_ra>
// kernel: tpu_custom_call.1
= control target key start
LH: loop header
LB: loop body
LE: loop exit
PB: predicated region body
PF: predicated region fallthrough
CT: control target
= control target key end

     0   :  { %s5774_s0 = inlined_call_operand.hbm [shape: f32[2,16,16,8], index: 0, kind: input, shape index: {}]   ;;  %s5775_s1 = inlined_call_operand.hbm [shape: f32[2,16,16,8], index: 1, kind: input, shape index: {}]   ;;  %s5776_s2 = inlined_call_operand.hbm [shape: f32[2,16,16,8], index: 2, kind: input, shape index: {}]   ;;  %s5777_s3 = inlined_call_operand.hbm [shape: f32[3,3,8,8], index: 3, kind: input, shape index: {}]   ;;  %s5778_s4 = inlined_call_operand.hbm [shape: f32[1,8], index: 4, kind: input, shape index: {}]   ;;  %s5779_s5 = inlined_call_operand.hbm [shape: f32[8,15], index: 5, kind: input, shape index: {}]   ;;  %s5780_s6 = inlined_call_operand.hbm [shape: f32[1,15], index: 6, kind: input, shape index: {}]   ;;  %s5781_s7 = inlined_call_operand.hbm [shape: f32[2,3,256], index: 7, kind: output, shape index: {0}]   ;;  %s5782_s8 = inlined_call_operand.hbm [shape: f32[2,12,256], index: 8, kind: output, shape index: {1}]  }
   0x1   :  { %5815 = sst [smem:[#allocation42_spill]] %s5775_s1 }
   0x2   :  { %5816 = sst [smem:[#allocation43_spill]] %s5776_s2 }
   0x3   :  { %5817 = sst [smem:[#allocation44_spill]] %s5777_s3 }
   0x4   :  { %5818 = sst [smem:[#allocation45_spill]] %s5778_s4 }
   0x5   :  { %5819 = sst [smem:[#allocation46_spill]] %s5779_s5 }
   0x6   :  { %5820 = sst [smem:[#allocation47_spill]] %s5780_s6 }
   0x7   :  { %5821 = sst [smem:[#allocation48_spill]] %s5781_s7 }
   0x8   :  { %5822 = sst [smem:[#allocation49_spill]] %s5782_s8 }
   0x9   :  { %14 = vsyncpa [#allocation6], 0 }
   0xa   :  { %16 = vsyncpa [#allocation6 + $0x1], 0 }
   0xb   :  { %17 = vsyncpa [#allocation9], 0 }
   0xc   :  { %19 = vsyncpa [#allocation9 + $0x1], 0 }
   0xd   :  { %20 = vsyncpa [#allocation12], 0 }
   0xe   :  { %21 = vsyncpa [#allocation15], 0 }
   0xf   :  { %22 = vsyncpa [#allocation7], 0 }
  0x10   :  { %24 = vsyncpa [#allocation7 + $0x1], 0 }
  0x11   :  { %25 = vsyncpa [#allocation19], 0 }
  0x12   :  { %27 = vsyncpa [#allocation19 + $0x1], 0  ;;  %s4614_s27 = smov 0   ;;  %s4616_s28 = smov 0  }
  0x13   :  { %s4618_s29 = smov 0   ;;  %s4620_s30 = smov 0  }
  0x14   :  { %s4622_s9 = smov 0   ;;  %s4624_s10 = smov 0  }
  0x15   :  { %s4626_s11 = smov 0   ;;  %s4628_s12 = smov 0  }
  0x16   :  { %s4630_s13 = smov 0   ;;  %s4632_s14 = smov 0  }
  0x17   :  { %s4634_s15 = smov 0   ;;  %s4636_s16 = smov 0  }
  0x18   :  { %s4638_s17 = smov 0   ;;  %s4640_s18 = smov 0  }
  0x19 LB: > { %5823 = sst [smem:[#allocation27_spill]] %s4500_s27  ;;  %s4685_s19 = sadd.s32 4294967295, %s4552_s18   ;;  %s4552_s18 = sphi %s4640_s18, %s33_s18   ;;  %s4548_s17 = sphi %s4638_s17, %s5905_s17   ;;  %s4544_s16 = sphi %s4636_s16, %s5904_s16   ;;  %s4540_s15 = sphi %s4634_s15, %s5915_s15   ;;  %s4536_s14 = sphi %s4632_s14, %s5902_s14   ;;  %s4532_s13 = sphi %s4630_s13, %s5914_s13   ;;  %s4528_s12 = sphi %s4628_s12, %s5913_s12   ;;  %s4524_s11 = sphi %s4626_s11, %s5912_s11   ;;  %s4520_s10 = sphi %s4624_s10, %s5911_s10   ;;  %s4516_s9 = sphi %s4622_s9, %s5910_s9   ;;  %s4512_s30 = sphi %s4620_s30, %s5909_s30   ;;  %s4508_s29 = sphi %s4618_s29, %s5908_s29   ;;  %s4504_s28 = sphi %s4616_s28, %s5898_s28   ;;  %s4500_s27 = sphi %s4614_s27, %s5907_s27  }
  0x1a   : > { %5824 = sst [smem:[#allocation28_spill]] %s4504_s28  ;;  %p3207_p0 = scmp.ge.s32.totalorder %s4552_s18, 1 }
  0x1b   : > { %5825 = sst [smem:[#allocation29_spill]] %s4508_s29  ;;  %p5788_p1 = scmp.eq.s32.totalorder %s4685_s19, 0 }
  0x1c   : > { %5826 = sst [smem:[#allocation30_spill]] %s4512_s30  ;;  %p290_p2 = scmp.lt.s32.totalorder %s4552_s18, 5 }
  0x1d   : > { %5827 = sst [smem:[#allocation31_spill]] %s4516_s9  ;;  %s4554_s21 = smov [#allocation11]  }
  0x1e   : > { %5828 = sst [smem:[#allocation32_spill]] %s4536_s14  ;;  %p4690_p3 = pnand %p3207_p0, %p290_p2 }
  0x1f   : > { %5829 = sst [smem:[#allocation33_spill]] %s4540_s15  ;;  %s302_s22 = sshll.u32 %s4554_s21, 4  ;;  %s303_s22 = int_to_ptr.vmem [resolvable:$true] %s302_s22 }
  0x20   : > { %5830 = sst [smem:[#allocation34_spill]] %s4544_s16  ;;  %p3994_p4 = pneg %p4690_p3 }
  0x21   : > { %5831 = sst [smem:[#allocation35_spill]] %s4548_s17  ;;  %s4555_s24 = smov [#allocation14]  }
  0x22   : > { %s5832_s20 = scalar_select %p4690_p3, 1, 0 }
  0x23   : > { %p4698_p5 = pnand %p3994_p4, %p5788_p1  ;;  %s327_s25 = sshll.u32 %s4555_s24, 4  ;;  %s4702_s25 = int_to_ptr.vmem [resolvable:$true] %s327_s25 }
  0x24   : > { %5833 = sst [smem:[#allocation36_spill]] %s5832_s20  ;;  %s5835_s3 = sld [smem:[#allocation44_spill]] }
  0x25   : > { %s5834_s23 = scalar_select %p4698_p5, 1, 0 }
  0x26   : > { %p4712_p7 = pneg %p4698_p5 }
  0x2a   : > { %s4156_s7 = scalar_lea.hbm %s5835_s3, 1152 }
  0x2b   : > { %p4157_p6 = scmp.ne.s32.totalorder %s5835_s3, %s4156_s7  ;;  %p4163_p10 = scmp.lt.u32.totalorder %s4156_s7, %s5835_s3 }
  0x2d   : > { %p4159_p8 = pnand %p4712_p7, %p4157_p6 }
  0x2f   : > { %p4160_p9 = pneg %p4159_p8 }
  0x31   : > { %p4165_p11 = pnand %p4163_p10, %p4160_p9 }
  0x33   : > { %4168 = shalt.err (!%p4165_p11)
}
  0x34   : > { %s4169_s8 = scalar_lea.vmem %s303_s22, 1152  ;;  %p4177_p2 = scmp.lt.s32.totalorder %s303_s22, %s303_s22 }
  0x35   : > { %p4170_p12 = scmp.ne.s32.totalorder %s303_s22, %s4169_s8  ;;  %p4178_p4 = scmp.lt.s32.totalorder %s4169_s8, %s4169_s8 }
  0x37   : > { %p4172_p13 = pnand %p4170_p12, %p4712_p7  ;;  %p4179_p1 = por %p4178_p4, %p4177_p2 }
  0x39   : > { %p4173_p0 = pneg %p4172_p13 }
  0x3b   : > { %p4180_p3 = pnand %p4179_p1, %p4173_p0 }
  0x3d   : > { %4183 = shalt.err (!%p4180_p3)
}
  0x3e   : > { %s5793_s14 = smov 128   ;;  %s5795_s15 = smov 8  }
  0x3f   : > { %3997 = dma.hbm_to_vmem [thread:$0]  (!%p4698_p5), %s5835_s3, 1152, %s303_s22, [#allocation12], %s5793_s14, %s5793_s14, %s5795_s15  }
  0x40   : > { %s5837_s5 = sld [smem:[#allocation46_spill]] }
  0x46   : > { %s4184_s2 = scalar_lea.hbm %s5837_s5, 128 }
  0x47   : > { %p4185_p1 = scmp.ne.s32.totalorder %s5837_s5, %s4184_s2  ;;  %p4191_p8 = scmp.lt.u32.totalorder %s4184_s2, %s5837_s5 }
  0x49   : > { %p4187_p3 = pnand %p4185_p1, %p4712_p7 }
  0x4b   : > { %p4188_p6 = pneg %p4187_p3 }
  0x4d   : > { %p4193_p9 = pnand %p4191_p8, %p4188_p6 }
  0x4f   : > { %4196 = shalt.err (!%p4193_p9)
}
  0x50   : > { %s4197_s22 = scalar_lea.vmem %s4702_s25, 128  ;;  %p4205_p13 = scmp.lt.s32.totalorder %s4702_s25, %s4702_s25 }
  0x51   : > { %p4198_p10 = scmp.ne.s32.totalorder %s4702_s25, %s4197_s22  ;;  %p4206_p0 = scmp.lt.s32.totalorder %s4197_s22, %s4197_s22 }
  0x53   : > { %p4200_p11 = pnand %p4198_p10, %p4712_p7  ;;  %p4207_p2 = por %p4206_p0, %p4205_p13 }
  0x55   : > { %p4201_p12 = pneg %p4200_p11 }
  0x57   : > { %p4208_p4 = pnand %p4207_p2, %p4201_p12 }
  0x59   : > { %4211 = shalt.err (!%p4208_p4)
}
  0x5a   : > { %4003 = dma.hbm_to_vmem [thread:$0]  (!%p4698_p5), %s5837_s5, 128, %s4702_s25, [#allocation15]  }
  0x5b   : > { %s3200_s28 = sadd.s32 4294967294, %s4552_s18   ;;  %s42_s29 = sadd.s32 1, %s4544_s16 }
  0x5c   : > { %p43_p1 = scmp.ge.s32.totalorder %s42_s29, 2  ;;  %s45_s7 = sadd.s32 1, %s4548_s17 }
  0x5d   : > { %p5804_p3 = scmp.eq.s32.totalorder %s4552_s18, 0  ;;  %p97_p6 = scmp.ne.s32.totalorder %s4520_s10, %s4516_s9 }
  0x5e   : > { %s5917_s29 = smov (%p43_p1, %s42_s29), 0  ;;  %s5919_s7 = smov (!%p43_p1, %s45_s7), %s4548_s17 }
  0x5f   : > { %5838 = sst [smem:[#allocation37_spill]] %s5917_s29  ;;  %p103_p8 = scmp.ne.s32.totalorder %s4516_s9, %s4512_s30 }
  0x60   : > { %p249_p9 = scmp.eq.s32.totalorder %s4685_s19, 3  ;;  %p4773_p10 = por %p97_p6, %p5804_p3 }
  0x61   : > { %p255_p11 = scmp.eq.s32.totalorder %s3200_s28, 3  ;;  %p5840_p12 = scmp.eq.s32.totalorder %s4685_s19, 0 }
  0x62   : > { %p4783_p0 = por %p249_p9, %p97_p6  ;;  %p5803_p4 = scmp.lt.s32.totalorder %s4552_s18, 4 }
  0x63   : > { %p4779_p13 = por %p103_p8, %p5840_p12  ;;  %p4787_p2 = por %p255_p11, %p103_p8 }
  0x64   : > { %s5843_s8 = scalar_select %p4783_p0, 1, 0 }
  0x65   : > { %s5841_s24 = scalar_select %p4779_p13, 1, 0 }
  0x66   : > { %5844 = sst [smem:[#allocation39_spill]] %s5843_s8  ;;  %s4793_s2 = sshll.u32 %s4548_s17, 5 }
  0x67   : > { %5842 = sst [smem:[#allocation38_spill]] %s5841_s24  ;;  %s376_s27 = sand.u32 1, %s4552_s18  }
  0x68   : > { %s5845_s22 = scalar_select %p4787_p2, 1, 0 }
  0x69   : > { %s378_s28 = sand.u32 1, %s4520_s10   ;;  %s3409_s26 = sshll.u32 %s4544_s16, 4 }
  0x6a   : > { %5846 = sst [smem:[#allocation40_spill]] %s5845_s22  ;;  %s3219_s20 = sshll.u32 %s378_s28, 7 }
  0x6b   : > { %s387_s14 = sadd.s32 %s3409_s26, %s4793_s2  ;;  %s380_s3 = scalar_lea.vmem [#allocation8], %s3219_s20 }
  0x6c   : > { %s3223_s15 = sshll.u32 %s387_s14, 7  ;;  %s390_s5 = sshll.u32 %s380_s3, 4  ;;  %s4804_s5 = int_to_ptr.vmem [resolvable:$true] %s390_s5 }
  0x6d   : > { %s5847_s1 = sld [smem:[#allocation42_spill]]  ;;  %p4810_p1 = pnand %p5803_p4, %p4773_p10 }
  0x6e   : > { %s4558_s3 = smov [#allocation13]   ;;  %s4816_s30 = scalar_lea.sflag [#allocation9], %s376_s27 }
  0x6f   : > { %s316_s14 = sshll.u32 %s4558_s3, 4  ;;  %p4214_p8 = pneg %p4810_p1  ;;  %s4814_s14 = int_to_ptr.vmem [resolvable:$true] %s316_s14 }
  0x73   : > { %s4802_s8 = scalar_lea.hbm %s5847_s1, %s3223_s15  ;;  %s4217_s25 = scalar_lea.hbm %s5847_s1, 8192 }
  0x74   : > { %s4212_s15 = scalar_lea.hbm %s4802_s8, 2048  ;;  %p4218_p10 = scmp.lt.u32.totalorder %s4802_s8, %s5847_s1 }
  0x75   : > { %p4213_p6 = scmp.ne.s32.totalorder %s4802_s8, %s4212_s15  ;;  %p4219_p12 = scmp.lt.u32.totalorder %s4217_s25, %s4212_s15 }
  0x76   : > { %p4221_p3 = scmp.lt.u32.totalorder %s4212_s15, %s4802_s8 }
  0x77   : > { %p4215_p9 = pnand %p4214_p8, %p4213_p6  ;;  %p4220_p4 = por %p4219_p12, %p4218_p10 }
  0x79   : > { %p4216_p11 = pneg %p4215_p9  ;;  %p4222_p2 = por %p4221_p3, %p4220_p4 }
  0x7b   : > { %p4223_p0 = pnand %p4222_p2, %p4216_p11 }
  0x7d   : > { %4226 = shalt.err (!%p4223_p0)
}
  0x7e   : > { %s4227_s27 = scalar_lea.vmem %s4804_s5, 2048  ;;  %s4559_s3 = smov [#allocation8]  }
  0x7f   : > { %p4228_p6 = scmp.ne.s32.totalorder %s4804_s5, %s4227_s27  ;;  %s4232_s20 = sshll.u32 %s4559_s3, 4  ;;  %s4233_s20 = int_to_ptr.vmem [resolvable:$false] %s4232_s20 }
  0x80   : > { %s4234_s22 = scalar_lea.vmem %s4233_s20, 4096  ;;  %p4235_p5 = scmp.lt.s32.totalorder %s4804_s5, %s4233_s20 }
  0x81   : > { %p4230_p9 = pnand %p4228_p6, %p4214_p8  ;;  %p4236_p10 = scmp.lt.s32.totalorder %s4234_s22, %s4227_s27 }
  0x83   : > { %p4231_p13 = pneg %p4230_p9  ;;  %p4237_p12 = por %p4236_p10, %p4235_p5 }
  0x85   : > { %p4238_p3 = pnand %p4237_p12, %p4231_p13 }
  0x87   : > { %4241 = shalt.err (!%p4238_p3)
}
  0x88   : > { %s5849_s15 = smov 8   ;;  %s5850_s26 = smov 128  }
  0x89   : > { %4013 = dma.hbm_to_vmem [thread:$0]  (!%p4810_p1), %s4802_s8, 2048, %s4804_s5, %s4816_s30, %s5850_s26, %s5850_s26, %s5849_s15  }
  0x8a   : > { %s5851_s4 = sld [smem:[#allocation45_spill]] }
  0x90   : > { %s4242_s3 = scalar_lea.hbm %s5851_s4, 16 }
  0x91   : > { %p4243_p5 = scmp.ne.s32.totalorder %s5851_s4, %s4242_s3  ;;  %p4249_p2 = scmp.lt.u32.totalorder %s4242_s3, %s5851_s4 }
  0x93   : > { %p4245_p13 = pnand %p4243_p5, %p4712_p7 }
  0x95   : > { %p4246_p0 = pneg %p4245_p13 }
  0x97   : > { %p4251_p4 = pnand %p4249_p2, %p4246_p0 }
  0x99   : > { %4254 = shalt.err (!%p4251_p4)
}
  0x9a   : > { %s4255_s5 = scalar_lea.vmem %s4814_s14, 16  ;;  %s4262_s1 = scalar_lea.vmem %s4814_s14, 32 }
  0x9b   : > { %p4256_p1 = scmp.ne.s32.totalorder %s4814_s14, %s4255_s5  ;;  %p4263_p6 = scmp.lt.s32.totalorder %s4814_s14, %s4814_s14 }
  0x9c   : > { %p4264_p9 = scmp.lt.s32.totalorder %s4262_s1, %s4255_s5 }
  0x9d   : > { %p4258_p8 = pnand %p4256_p1, %p4712_p7 }
  0x9e   : > { %p4265_p10 = por %p4264_p9, %p4263_p6 }
  0x9f   : > { %p4259_p11 = pneg %p4258_p8 }
  0xa1   : > { %p4266_p12 = pnand %p4265_p10, %p4259_p11 }
  0xa3   : > { %4269 = shalt.err (!%p4266_p12)
}
  0xa4   : > { %p5852_p3 = scmp.ne.s32.totalorder %s5834_s23, 0  ;;  %s4560_s25 = smov [#allocation16]  }
  0xa5   : > { %s338_s24 = sshll.u32 %s4560_s25, 4  ;;  %s5853_s6 = sld [smem:[#allocation47_spill]]  ;;  %s339_s24 = int_to_ptr.vmem [resolvable:$true] %s338_s24 }
  0xa6   : > { %4000 = dma.hbm_to_vmem [thread:$0]  (!%p5852_p3), %s5851_s4, 16, %s4814_s14, [#allocation12]  }
  0xab   : > { %s4270_s28 = scalar_lea.hbm %s5853_s6, 16 }
  0xac   : > { %p4271_p5 = scmp.ne.s32.totalorder %s5853_s6, %s4270_s28  ;;  %p4277_p2 = scmp.lt.u32.totalorder %s4270_s28, %s5853_s6 }
  0xae   : > { %p4273_p13 = pnand %p4271_p5, %p4712_p7 }
  0xb0   : > { %p4274_p0 = pneg %p4273_p13 }
  0xb2   : > { %p4279_p4 = pnand %p4277_p2, %p4274_p0 }
  0xb4   : > { %4282 = shalt.err (!%p4279_p4)
}
  0xb5   : > { %s4283_s14 = scalar_lea.vmem %s339_s24, 16  ;;  %s4290_s8 = scalar_lea.vmem %s339_s24, 32 }
  0xb6   : > { %p4284_p1 = scmp.ne.s32.totalorder %s339_s24, %s4283_s14  ;;  %p4291_p6 = scmp.lt.s32.totalorder %s339_s24, %s339_s24 }
  0xb7   : > { %p4292_p9 = scmp.lt.s32.totalorder %s4290_s8, %s4283_s14 }
  0xb8   : > { %p4286_p8 = pnand %p4284_p1, %p4712_p7 }
  0xb9   : > { %p4293_p10 = por %p4292_p9, %p4291_p6 }
  0xba   : > { %p4287_p11 = pneg %p4286_p8 }
  0xbc   : > { %p4294_p12 = pnand %p4293_p10, %p4287_p11 }
  0xbe   : > { %4297 = shalt.err (!%p4294_p12)
}
  0xbf   : > { %4006 = dma.hbm_to_vmem [thread:$0]  (!%p5852_p3), %s5853_s6, 16, %s339_s24, [#allocation15]  }
  0xc0   : > { %p47_p7 = scmp.ge.s32.totalorder %s5919_s7, 2  ;;  %s3201_s9 = sshll.u32 %s4544_s16, 3 }
  0xc1   : > { %s3202_s21 = sadd.s32 4294967295, %s3201_s9  ;;  %s3203_s23 = sshll.u32 %s5917_s29, 3 }
  0xc2   : > { %s5921_s7 = smov (%p47_p7, %s5919_s7), 0  ;;  %p51_p5 = scmp.gt.s32.totalorder %s3202_s21, 0 }
  0xc3   : > { %5854 = sst [smem:[#allocation41_spill]] %s5921_s7  ;;  %s3204_s3 = sadd.s32 4294967295, %s3203_s23 }
  0xc4   : > { %p55_p13 = scmp.gt.s32.totalorder %s3204_s3, 0  ;;  %s4897_s20 = ssub.s32 %s4548_s17, %s5921_s7 }
  0xc5   : > { %s5923_s21 = smov (!%p51_p5, %s3202_s21), 0  ;;  %s62_s24 = sadd.s32 1, %s4532_s13 }
  0xc6   : > { %s5925_s3 = smov (!%p55_p13, %s3204_s3), 0  ;;  %p69_p3 = scmp.ne.s32.totalorder %s4532_s13, %s4528_s12 }
  0xc7   : > { %s58_s28 = ssub.s32 %s5923_s21, %s5925_s3  ;;  %p75_p0 = scmp.ne.s32.totalorder %s4528_s12, %s4524_s11 }
  0xc8   : > { %s59_s27 = sor.u32 %s58_s28, %s4897_s20  ;;  %p5855_p2 = scmp.eq.s32.totalorder %s4552_s18, 0 }
  0xc9   : > { %p60_p1 = scmp.eq.s32.totalorder %s59_s27, 0  ;;  %p5857_p8 = scmp.eq.s32.totalorder %s4685_s19, 0 }
  0xca   : > { %p4907_p4 = por %p5855_p2, %p69_p3  ;;  %s5859_s14 = ssub.s32 %s4544_s16, %s5917_s29 }
  0xcb   : > { %p4913_p11 = por %p5857_p8, %p75_p0  ;;  %s87_s8 = sor.u32 %s5859_s14, %s4897_s20 }
  0xcc   : > { %s4921_s22 = sadd.s32 8, %s3201_s9  ;;  %p88_p6 = scmp.eq.s32.totalorder %s87_s8, 0 }
  0xcd   : > { %s4924_s11 = scalar_select %p60_p1, %s4532_s13, %s62_s24  }
  0xce   : > { %s4927_s25 = sadd.s32 8, %s3203_s23  ;;  %s349_s3 = sand.u32 1, %s4532_s13  }
  0xcf   : > { %s5860_s28 = sadd.s32 1, %s4520_s10  ;;  %s3213_s4 = sshll.u32 %s349_s3, 4 }
  0xd0   : > { %s4933_s27 = scalar_select %p88_p6, %s4520_s10, %s5860_s28  }
  0xd1   : > { %s3216_s6 = sshll.u32 %s5923_s21, 1  ;;  %s353_s7 = scalar_lea.vmem [#allocation5], %s3213_s4 }
  0xd2   : > { %s363_s14 = sadd.s32 %s4793_s2, %s3216_s6  ;;  %s366_s29 = sshll.u32 %s353_s7, 4  ;;  %s4942_s29 = int_to_ptr.vmem [resolvable:$true] %s366_s29 }
  0xd3   : > { %s3218_s9 = sshll.u32 %s363_s14, 7  ;;  %p5861_p12 = scmp.lt.s32.totalorder %s4552_s18, 4 }
  0xd4   : > { %s4940_s24 = scalar_lea.hbm %s5774_s0, %s3218_s9  ;;  %s4952_s4 = scalar_lea.sflag [#allocation6], %s349_s3 }
  0xd5   : > { %p4948_p7 = pnand %p5861_p12, %p4907_p4  ;;  %s4298_s6 = scalar_lea.hbm %s4940_s24, 256 }
  0xd6   : > { %p4299_p5 = scmp.ne.s32.totalorder %s4940_s24, %s4298_s6  ;;  %s4303_s7 = scalar_lea.hbm %s5774_s0, 8192 }
  0xd7   : > { %p4300_p13 = pneg %p4948_p7  ;;  %p4304_p2 = scmp.lt.u32.totalorder %s4940_s24, %s5774_s0 }
  0xd8   : > { %p4305_p4 = scmp.lt.u32.totalorder %s4303_s7, %s4298_s6  ;;  %p4307_p8 = scmp.lt.u32.totalorder %s4298_s6, %s4940_s24 }
  0xd9   : > { %p4301_p3 = pnand %p4300_p13, %p4299_p5 }
  0xda   : > { %p4306_p1 = por %p4305_p4, %p4304_p2 }
  0xdb   : > { %p4302_p0 = pneg %p4301_p3 }
  0xdc   : > { %p4308_p6 = por %p4307_p8, %p4306_p1 }
  0xde   : > { %p4309_p12 = pnand %p4308_p6, %p4302_p0 }
  0xe0   : > { %4312 = shalt.err (!%p4309_p12)
}
  0xe1   : > { %s4313_s8 = scalar_lea.vmem %s4942_s29, 256  ;;  %s4561_s3 = smov [#allocation5]  }
  0xe2   : > { %p4314_p5 = scmp.ne.s32.totalorder %s4942_s29, %s4313_s8  ;;  %s4318_s28 = sshll.u32 %s4561_s3, 4  ;;  %s4319_s28 = int_to_ptr.vmem [resolvable:$false] %s4318_s28 }
  0xe3   : > { %s4320_s14 = scalar_lea.vmem %s4319_s28, 512  ;;  %p4321_p9 = scmp.lt.s32.totalorder %s4942_s29, %s4319_s28 }
  0xe4   : > { %p4316_p3 = pnand %p4314_p5, %p4300_p13  ;;  %p4322_p2 = scmp.lt.s32.totalorder %s4320_s14, %s4313_s8 }
  0xe6   : > { %p4317_p10 = pneg %p4316_p3  ;;  %p4323_p4 = por %p4322_p2, %p4321_p9 }
  0xe8   : > { %p4324_p1 = pnand %p4323_p4, %p4317_p10 }
  0xea   : > { %4327 = shalt.err (!%p4324_p1)
}
  0xeb   : > { %s5863_s9 = sld [smem:[#allocation29_spill]]  ;;  %s5864_s6 = sld [smem:[#allocation28_spill]] }
  0xec   : > { %s5865_s16 = sld [smem:[#allocation27_spill]]  ;;  %p5866_p9 = scmp.lt.s32.totalorder %s4921_s22, 15 }
  0xed   : > { %4010 = dma.hbm_to_vmem [thread:$0]  (!%p4948_p7), %s4940_s24, 256, %s4942_s29, %s4952_s4, %s5850_s26, %s5850_s26, %s5849_s15  }
  0xee   : > { %s5927_s22 = smov (!%p5866_p9, %s4921_s22), 15  ;;  %p5867_p10 = scmp.lt.s32.totalorder %s4927_s25, 15 }
  0xef   : > { %p5868_p8 = scmp.eq.s32.totalorder %s4552_s18, 0  ;;  %p5870_p5 = scmp.eq.s32.totalorder %s4685_s19, 0 }
  0xf0   : > { %s5929_s25 = smov (!%p5867_p10, %s4927_s25), 15  ;;  %s3226_s4 = sshll.u32 %s5927_s22, 1 }
  0xf1   : > { %s126_s23 = sadd.s32 1, %s5863_s9  ;;  %p133_p13 = scmp.ne.s32.totalorder %s5863_s9, %s5864_s6 }
  0xf2   : > { %s122_s17 = ssub.s32 %s5927_s22, %s5929_s25  ;;  %p139_p0 = scmp.ne.s32.totalorder %s5864_s6, %s5865_s16 }
  0xf3   : > { %s123_s7 = sor.u32 %s122_s17, %s4897_s20  ;;  %p4997_p6 = por %p133_p13, %p5868_p8 }
  0xf4   : > { %p124_p12 = scmp.eq.s32.totalorder %s123_s7, 0  ;;  %p5003_p3 = por %p139_p0, %p5870_p5 }
  0xf5   : > { %s402_s24 = sand.u32 1, %s5863_s9   ;;  %s414_s5 = sadd.s32 %s3226_s4, %s4793_s2 }
  0xf6   : > { %s5871_s29 = scalar_select %p5003_p3, 1, 0 }
  0xf7   : > { %s5931_s9 = smov (!%p124_p12, %s5863_s9), %s126_s23  ;;  %s3224_s25 = sshll.u32 %s402_s24, 4 }
  0xf8   : > { %s3228_s8 = sshll.u32 %s414_s5, 7  ;;  %s5872_s28 = sld [smem:[#allocation43_spill]] }
  0xf9   : > { %s404_s16 = scalar_lea.vmem [#allocation10], %s3224_s25  ;;  %p5874_p7 = scmp.lt.s32.totalorder %s4552_s18, 4 }
  0xfa   : > { %s417_s17 = sshll.u32 %s404_s16, 4  ;;  %s5017_s17 = int_to_ptr.vmem [resolvable:$true] %s417_s17 }
  0xfb   : > { %p5023_p2 = pnand %p5874_p7, %p4997_p6 }
  0xfd   : > { %p4330_p1 = pneg %p5023_p2 }
  0xfe   : > { %s5873_s6 = smov %s5872_s28  ;;  %s5015_s14 = scalar_lea.hbm %s5872_s28, %s3228_s8 }
  0xff   : > { %s4328_s2 = scalar_lea.hbm %s5015_s14, 256  ;;  %s4333_s24 = scalar_lea.hbm %s5873_s6, 8192 }
 0x100   : > { %p4329_p4 = scmp.ne.s32.totalorder %s5015_s14, %s4328_s2  ;;  %p4334_p13 = scmp.lt.u32.totalorder %s5015_s14, %s5873_s6 }
 0x101   : > { %p4335_p0 = scmp.lt.u32.totalorder %s4333_s24, %s4328_s2  ;;  %p4337_p6 = scmp.lt.u32.totalorder %s4328_s2, %s5015_s14 }
 0x102   : > { %p4331_p9 = pnand %p4330_p1, %p4329_p4 }
 0x103   : > { %p4336_p8 = por %p4335_p0, %p4334_p13 }
 0x104   : > { %p4332_p10 = pneg %p4331_p9 }
 0x105   : > { %p4338_p12 = por %p4337_p6, %p4336_p8 }
 0x107   : > { %p4339_p5 = pnand %p4338_p12, %p4332_p10 }
 0x109   : > { %4342 = shalt.err (!%p4339_p5)
}
 0x10a   : > { %s4343_s25 = scalar_lea.vmem %s5017_s17, 256  ;;  %s4562_s5 = smov [#allocation10]  }
 0x10b   : > { %p4344_p7 = scmp.ne.s32.totalorder %s5017_s17, %s4343_s25  ;;  %s4348_s8 = sshll.u32 %s4562_s5, 4  ;;  %s4349_s8 = int_to_ptr.vmem [resolvable:$false] %s4348_s8 }
 0x10c   : > { %s4350_s20 = scalar_lea.vmem %s4349_s8, 512  ;;  %p4351_p3 = scmp.lt.s32.totalorder %s5017_s17, %s4349_s8 }
 0x10d   : > { %p4346_p4 = pnand %p4344_p7, %p4330_p1  ;;  %p4352_p13 = scmp.lt.s32.totalorder %s4350_s20, %s4343_s25 }
 0x10f   : > { %p4347_p9 = pneg %p4346_p4  ;;  %p4353_p0 = por %p4352_p13, %p4351_p3 }
 0x111   : > { %p4354_p8 = pnand %p4353_p0, %p4347_p9 }
 0x113   : > { %4357 = shalt.err (!%p4354_p8)
}
 0x114   : > { %4016 = dma.hbm_to_vmem [thread:$0]  (!%p5023_p2), %s5015_s14, 256, %s5017_s17, %s4816_s30, %s5850_s26, %s5850_s26, %s5849_s15  }
 0x115   : > { %s5876_s3 = sld [smem:[#allocation36_spill]] }
 0x11b   : > { %p5877_p1 = scmp.ne.s32.totalorder %s5876_s3, 0 }
 0x11c   : > { %s431_s28 = sand.u32 (!%p5877_p1), 1, %s4528_s12  }
 0x11d   : > { %429 = sbr.rel (%p5877_p1) target bundleno = 1071 (0x42f), region = 48  ;;  %s5059_s16 = sshll.u32 (!%p5877_p1), %s431_s28, 4 }
 0x11e   : > { %s432_s2 = scalar_lea.sflag (!%p5877_p1), [#allocation6], %s431_s28  ;;  %s435_s23 = scalar_lea.vmem (!%p5877_p1), [#allocation5], %s5059_s16 }
 0x124   : > { %4471 = dma.done.wait (%p4913_p11), %s432_s2, 256  }
 0x125   : > { %4473 = vsyncadd (%p4913_p11), %s432_s2, 4294967040  ;;  %s5878_s22 = sld [smem:[#allocation31_spill]]  ;;  %s5879_s7 = sld [smem:[#allocation38_spill]] }
 0x126   : > { %s440_s30 = sand.u32 1, %s4685_s19  }
 0x127   : > { %s441_s14 = scalar_lea.sflag [#allocation9], %s440_s30 }
 0x12b   : > { %s5068_s15 = sand.u32 1, %s5878_s22   ;;  %p5880_p3 = scmp.ne.s32.totalorder %s5879_s7, 0 }
 0x12c   : > { %s3231_s26 = sshll.u32 %s5068_s15, 7 }
 0x12d   : > { %s5071_s17 = scalar_lea.vmem [#allocation8], %s3231_s26 }
 0x12e   : > { %4475 = dma.done.wait (%p5880_p3), %s441_s14, 2048  }
 0x12f   : > { %4477 = vsyncadd (%p5880_p3), %s441_s14, 4294965248  ;;  %s5881_s24 = sld [smem:[#allocation28_spill]]  ;;  %p5882_p11 = scmp.ne.s32.totalorder %s5871_s29, 0 }
 0x135   : > { %s451_s1 = sand.u32 1, %s5881_s24  }
 0x136   : > { %s5078_s21 = sshll.u32 %s451_s1, 4 }
 0x137   : > { %s453_s4 = scalar_lea.vmem [#allocation10], %s5078_s21 }
 0x138   : > { %4479 = dma.done.wait (%p5882_p11), %s441_s14, 256  }
 0x139   : > { %4481 = vsyncadd (%p5882_p11), %s441_s14, 4294967040  ;;  %p5883_p2 = scmp.eq.s32.totalorder %s4685_s19, 0 }
 0x13b   : > { %4483 = dma.done.wait (%p5883_p2), [#allocation12], 1168   ;;  %p5884_p10 = pmov %p5883_p2 }
 0x13c   : > { %p5885_p6 = pmov %p5883_p2 }
 0x13d   : > { %4485 = vsyncadd (%p5884_p10), [#allocation12], 4294966128 }
 0x13e   : > { %4487 = dma.done.wait (%p5885_p6), [#allocation15], 144   ;;  %p5886_p12 = pmov %p5883_p2 }
 0x13f   : > { %vm622_vm0 = vcmask 57344   ;;  %v4563_v0 = vmov 0.0   ;;  %s5887_s29 = sld [smem:[#allocation32_spill]]  ;;  %vm537_vm1 = vcmask 64512   ;;  %v1558_v1 = vld [vmem:[#allocation11 + $0x20] sm:$0xff]  ;;  %v5120_v3 = vld [vmem:[#allocation11 + $0x38] sm:$0xff] }
 0x140   : > { %4489 = vsyncadd (%p5886_p12), [#allocation15], 4294967152  ;;  %624 = vst.msk [vmem:[#allocation3 + $0x10] sm:$0x1] %vm622_vm0, %v4563_v0  ;;  %v540_v2 = vld [vmem:[%s5071_s17] sm:$0xff]  ;;  %3684 = vmatprep.subr.mxu0 %v1558_v1  ;;  %v541_v4 = vld [vmem:[%s5071_s17 + $0x8] sm:$0xff] }
 0x141   : > { %623 = vst.msk [vmem:[#allocation3] sm:$0x1] %vm622_vm0, %v4563_v0  ;;  %625 = vst.msk [vmem:[#allocation3 + $0x20] sm:$0x1] %vm622_vm0, %v4563_v0  ;;  %v542_v5 = vld [vmem:[%s5071_s17 + $0x10] sm:$0xff]  ;;  %v543_v6 = vld [vmem:[%s5071_s17 + $0x18] sm:$0xff]  ;;  %3685 = vmatpush3.msra.mxu0 %v1558_v1 }
 0x142   : > { %626 = vst.msk [vmem:[#allocation3 + $0x30] sm:$0x1] %vm622_vm0, %v4563_v0  ;;  %627 = vst.msk [vmem:[#allocation3 + $0x40] sm:$0x1] %vm622_vm0, %v4563_v0  ;;  %v699_v7 = vld [vmem:[#allocation11 + $0x18] sm:$0xff]  ;;  %v544_v8 = vld [vmem:[%s5071_s17 + $0x20] sm:$0xff]  ;;  %3710 = vmatprep.subr.mxu0 %v5120_v3 }
 0x143   : > { %628 = vst.msk [vmem:[#allocation3 + $0x50] sm:$0x1] %vm622_vm0, %v4563_v0  ;;  %629 = vst.msk [vmem:[#allocation3 + $0x60] sm:$0x1] %vm622_vm0, %v4563_v0  ;;  %v545_v9 = vld [vmem:[%s5071_s17 + $0x28] sm:$0xff]  ;;  %3580 = vmatprep.subr.mxu1 %v699_v7  ;;  %v546_v10 = vld [vmem:[%s5071_s17 + $0x30] sm:$0xff] }
 0x144   : > { %630 = vst.msk [vmem:[#allocation3 + $0x70] sm:$0x1] %vm622_vm0, %v4563_v0  ;;  %631 = vst.msk [vmem:[#allocation3 + $0x80] sm:$0x1] %vm622_vm0, %v4563_v0  ;;  %v547_v11 = vld [vmem:[%s5071_s17 + $0x38] sm:$0xff]  ;;  %v548_v12 = vld [vmem:[%s5071_s17 + $0x40] sm:$0xff]  ;;  %3581 = vmatpush3.msra.mxu1 %v699_v7 }
 0x145   : > { %632 = vst.msk [vmem:[#allocation3 + $0x90] sm:$0x1] %vm622_vm0, %v4563_v0  ;;  %654 = vst.msk [vmem:[#allocation4 + $0xf] sm:$0x1] %vm622_vm0, %v4563_v0  ;;  %p526_p5 = scmp.gt.s32.totalorder %s5887_s29, 0  ;;  %p529_p7 = scmp.lt.s32.totalorder %s5887_s29, 1 }
 0x146   : > { %655 = vst.msk [vmem:[#allocation4 + $0x1f] sm:$0x1] %vm622_vm0, %v4563_v0  ;;  %656 = vst.msk [vmem:[#allocation4 + $0x2f] sm:$0x1] %vm622_vm0, %v4563_v0  ;;  %v549_v13 = vld [vmem:[%s5071_s17 + $0x48] sm:$0xff]  ;;  %v550_v14 = vld [vmem:[%s5071_s17 + $0x50] sm:$0xff] }
 0x147   : > { %657 = vst.msk [vmem:[#allocation4 + $0x3f] sm:$0x1] %vm622_vm0, %v4563_v0  ;;  %658 = vst.msk [vmem:[#allocation4 + $0x4f] sm:$0x1] %vm622_vm0, %v4563_v0  ;;  %s5115_s19 = scalar_select %p526_p5, 1, 0 }
 0x148   : > { %659 = vst.msk [vmem:[#allocation4 + $0x5f] sm:$0x1] %vm622_vm0, %v4563_v0  ;;  %660 = vst.msk [vmem:[#allocation4 + $0x6f] sm:$0x1] %vm622_vm0, %v4563_v0  ;;  %s5117_s25 = scalar_select %p529_p7, 1, 0 }
 0x149   : > { %661 = vst.msk [vmem:[#allocation4 + $0x7f] sm:$0x1] %vm622_vm0, %v4563_v0  ;;  %662 = vst.msk [vmem:[#allocation4 + $0x8f] sm:$0x1] %vm622_vm0, %v4563_v0  ;;  %s528_s5 = scvt.s32.f32 %s5115_s19  ;;  %v551_v15 = vld [vmem:[%s5071_s17 + $0x58] sm:$0xff]  ;;  %v552_v17 = vld [vmem:[%s5071_s17 + $0x60] sm:$0xff] }
 0x14a   : > { %663 = vst.msk [vmem:[#allocation4 + $0x9f] sm:$0x1] %vm622_vm0, %v4563_v0  ;;  %s531_s8 = scvt.s32.f32 %s5117_s25  ;;  %v553_v18 = vld [vmem:[%s5071_s17 + $0x68] sm:$0xff]  ;;  %v554_v19 = vld [vmem:[%s5071_s17 + $0x70] sm:$0xff]  ;;  %v555_v21 = vld [vmem:[%s5071_s17 + $0x78] sm:$0xff]  ;;  %vm602_vm2 = vcmask 63488  }
 0x14b   : > { %557 = vst.msk [vmem:[#allocation2 + $0x10] sm:$0xff] %vm537_vm1, %v540_v2  ;;  %558 = vst.msk [vmem:[#allocation2 + $0x18] sm:$0xff] %vm537_vm1, %v541_v4  ;;  %v534_v16 = vstv %s528_s5  ;;  %v5155_v22 = vld [vmem:[#allocation11] sm:$0xff]  ;;  %v533_v24 = vld [vmem:[%s435_s23 + $0x8] sm:$0xff]  ;;  %vm633_vm3 = vcmask 64513   ;;  %s5888_s20 = sld [smem:[#allocation33_spill]] }
 0x14c   : > { %559 = vst.msk [vmem:[#allocation2 + $0x20] sm:$0xff] %vm537_vm1, %v542_v5  ;;  %560 = vst.msk [vmem:[#allocation2 + $0x28] sm:$0xff] %vm537_vm1, %v543_v6  ;;  %v575_v20 = vstv %s531_s8  ;;  %3606 = vmatprep.subr.mxu1 %v5155_v22  ;;  %v532_v23 = vld [vmem:[%s435_s23] sm:$0xff]  ;;  %v536_v29 = vmul.f32 %v534_v16, %v533_v24  ;;  %v574_v31 = vld [vmem:[%s453_s4 + $0x8] sm:$0xff]  ;;  %s3237_s28 = sshll.u32 %s5068_s15, 2  ;;  %s3238_s2 = sshll.u32 %s5068_s15, 4 }
 0x14d   : > { %561 = vst.msk [vmem:[#allocation2 + $0x30] sm:$0xff] %vm537_vm1, %v544_v8  ;;  %562 = vst.msk [vmem:[#allocation2 + $0x38] sm:$0xff] %vm537_vm1, %v545_v9  ;;  %v573_v25 = vld [vmem:[%s453_s4] sm:$0xff]  ;;  %v535_v28 = vmul.f32 %v534_v16, %v532_v23  ;;  %v577_v35 = vmul.f32 %v575_v20, %v574_v31  ;;  %v2241_v4 = vld [vmem:[#allocation11 + $0x28] sm:$0xff]  ;;  %s509_s22 = scalar_lea.vmem [#allocation17], %s3237_s28  ;;  %s5889_s30 = sld [smem:[#allocation39_spill]] }
 0x14e   : > { %563 = vst.msk [vmem:[#allocation2 + $0x40] sm:$0xff] %vm537_vm1, %v546_v10  ;;  %564 = vst.msk [vmem:[#allocation2 + $0x48] sm:$0xff] %vm537_vm1, %v547_v11  ;;  %v5167_v27 = vld [vmem:[#allocation11 + $0x10] sm:$0xff]  ;;  %v576_v30 = vmul.f32 %v575_v20, %v573_v25  ;;  %v1331_v8 = vld [vmem:[#allocation11 + $0x8] sm:$0xff]  ;;  %s2975_s7 = sshll.u32 %s509_s22, 4  ;;  %s5657_s17 = scalar_lea.vmem [#allocation18], %s3238_s2  ;;  %s5660_s7 = int_to_ptr.vmem [resolvable:$true] %s2975_s7 }
 0x14f   : > { %565 = vst.msk [vmem:[#allocation2 + $0x50] sm:$0xff] %vm537_vm1, %v548_v12  ;;  %566 = vst.msk [vmem:[#allocation2 + $0x58] sm:$0xff] %vm537_vm1, %v549_v13  ;;  %v5295_v52 = vld [vmem:[#allocation11 + $0x30] sm:$0xff]  ;;  %v2469_v12 = vld [vmem:[#allocation11 + $0x40] sm:$0xff]  ;;  %s2989_s24 = sshll.u32 %s5657_s17, 4  ;;  %s5890_s19 = sld [smem:[#allocation48_spill]]  ;;  %s5667_s24 = int_to_ptr.vmem [resolvable:$true] %s2989_s24 }
 0x150   : > { %567 = vst.msk [vmem:[#allocation2 + $0x60] sm:$0xff] %vm537_vm1, %v550_v14  ;;  %568 = vst.msk [vmem:[#allocation2 + $0x68] sm:$0xff] %vm537_vm1, %v551_v15  ;;  %s5891_s8 = sld [smem:[#allocation49_spill]]  ;;  %s4358_s28 = scalar_lea.vmem %s5660_s7, 64 }
 0x151   : > { %569 = vst.msk [vmem:[#allocation2 + $0x70] sm:$0xff] %vm537_vm1, %v552_v17  ;;  %570 = vst.msk [vmem:[#allocation2 + $0x78] sm:$0xff] %vm537_vm1, %v553_v18  ;;  %s3403_s3 = sshll.u32 %s5888_s20, 1  ;;  %s3405_s16 = sshll.u32 %s5888_s20, 2 }
 0x152   : > { %571 = vst.msk [vmem:[#allocation2 + $0x80] sm:$0xff] %vm537_vm1, %v554_v19  ;;  %572 = vst.msk [vmem:[#allocation2 + $0x88] sm:$0xff] %vm537_vm1, %v555_v21  ;;  %v5165_v26 = vld [vmem:[#allocation2 + $0x10] sm:$0xff]  ;;  %v5173_v32 = vld [vmem:[#allocation2 + $0x18] sm:$0xff]  ;;  %s2971_s23 = sadd.s32 %s5887_s29, %s3403_s3  ;;  %s2986_s26 = sadd.s32 %s5887_s29, %s3405_s16 }
 0x153   : > { %3686 = vmatprep.mubr.msk.f32.mxu0 %vm537_vm1, %v5165_v26  ;;  %v5175_v33 = vld [vmem:[#allocation2 + $0x20] sm:$0xff]  ;;  %v5177_v34 = vld [vmem:[#allocation2 + $0x28] sm:$0xff]  ;;  %604 = vst.msk [vmem:[#allocation3 + $0x11] sm:$0xff] %vm537_vm1, %v5165_v26  ;;  %637 = vst.msk [vmem:[#allocation4 + $0x17] sm:$0xff] %vm537_vm1, %v5173_v32  ;;  %s3404_s14 = sshll.u32 %s2971_s23, 6  ;;  %s3406_s1 = sshll.u32 %s2986_s26, 7 }
 0x154   : > { %636 = vst.msk [vmem:[#allocation4 + $0xf] sm:$0xfe] %vm633_vm3, %v5165_v26  ;;  %3687 = vmatmul.mubr.msk.f32.vlgmr.msra.gmra.mrb[0].mxu0 %vm537_vm1, %v5173_v32  ;;  %v5185_v36 = vld [vmem:[#allocation2 + $0x30] sm:$0xff]  ;;  %v5191_v37 = vld [vmem:[#allocation2 + $0x38] sm:$0xff]  ;;  %638 = vst.msk [vmem:[#allocation4 + $0x1f] sm:$0xfe] %vm633_vm3, %v5175_v33  ;;  %p4359_p4 = scmp.ne.s32.totalorder %s5660_s7, %s4358_s28 }
 0x155   : > { %605 = vst.msk [vmem:[#allocation3 + $0x19] sm:$0x7f] %vm602_vm2, %v5173_v32  ;;  %607 = vst.msk [vmem:[#allocation3 + $0x29] sm:$0x7f] %vm602_vm2, %v5177_v34  ;;  %3711 = vmatpush3.msra.mxu0 %v5120_v3  ;;  %3689 = vmatprep.mubr.msk.f32.mxu0 %vm537_vm1, %v5175_v33  ;;  %v5207_v38 = vld [vmem:[#allocation2 + $0x40] sm:$0xff]  ;;  %v5209_v39 = vld [vmem:[#allocation2 + $0x48] sm:$0xff]  ;;  %s5665_s25 = scalar_lea.hbm %s5890_s19, %s3404_s14 }
 0x156   : > { %606 = vst.msk [vmem:[#allocation3 + $0x21] sm:$0xff] %vm537_vm1, %v5175_v33  ;;  %639 = vst.msk [vmem:[#allocation4 + $0x27] sm:$0xff] %vm537_vm1, %v5177_v34  ;;  %v5213_v40 = vld [vmem:[#allocation2 + $0x50] sm:$0xff]  ;;  %v5222_v41 = vld [vmem:[#allocation2 + $0x58] sm:$0xff]  ;;  %3736 = vmatprep.subr.mxu0 %v5167_v27  ;;  %s5673_s20 = scalar_lea.hbm %s5891_s8, %s3406_s1  ;;  %s2955_s3 = scalar_lea.sflag [#allocation7], %s5068_s15 }
 0x157   : > { %538 = vst.msk [vmem:[#allocation2] sm:$0xff] %vm537_vm1, %v535_v28  ;;  %539 = vst.msk [vmem:[#allocation2 + $0x8] sm:$0xff] %vm537_vm1, %v536_v29  ;;  %v5226_v42 = vld [vmem:[#allocation2 + $0x60] sm:$0xff]  ;;  %v5232_v43 = vld [vmem:[#allocation2 + $0x68] sm:$0xff]  ;;  %p5892_p9 = scmp.ne.s32.totalorder %s5889_s30, 0  ;;  %s4564_s16 = smov [#allocation17]  }
 0x158   : > { %579 = vst.msk [vmem:[#allocation2 + $0x90] sm:$0xff] %vm537_vm1, %v576_v30  ;;  %608 = vst.msk [vmem:[#allocation3 + $0x31] sm:$0xff] %vm537_vm1, %v5185_v36  ;;  %v5241_v44 = vld [vmem:[#allocation2 + $0x70] sm:$0xff]  ;;  %v5247_v45 = vld [vmem:[#allocation2 + $0x78] sm:$0xff]  ;;  %3690 = vmatmul.mubr.msk.f32.gmra.mrb[2].mxu0 %vm537_vm1, %v5177_v34  ;;  %s4362_s2 = sshll.u32 %s4564_s16, 4  ;;  %s4363_s2 = int_to_ptr.vmem [resolvable:$false] %s4362_s2 }
 0x159   : > { %609 = vst.msk [vmem:[#allocation3 + $0x39] sm:$0x7f] %vm602_vm2, %v5191_v37  ;;  %611 = vst.msk [vmem:[#allocation3 + $0x49] sm:$0x7f] %vm602_vm2, %v5209_v39  ;;  %v5251_v46 = vld [vmem:[#allocation2 + $0x80] sm:$0xff]  ;;  %v5261_v47 = vld [vmem:[#allocation2 + $0x88] sm:$0xff]  ;;  %3692 = vmatprep.mubr.msk.f32.mxu0 %vm537_vm1, %v5185_v36  ;;  %p4360_p13 = pnand %p4359_p4, %p5892_p9  ;;  %p4365_p8 = scmp.lt.s32.totalorder %s5660_s7, %s4363_s2 }
 0x15a   : > { %641 = vst.msk [vmem:[#allocation4 + $0x37] sm:$0xff] %vm537_vm1, %v5191_v37  ;;  %580 = vst.msk [vmem:[#allocation2 + $0x98] sm:$0xff] %vm537_vm1, %v577_v35  ;;  %v5281_v48 = vld [vmem:[#allocation3 + $0x10] sm:$0xff]  ;;  %v1999_v13 = vld [vmem:[#allocation4 + $0x18] sm:$0xff]  ;;  %s4364_s23 = scalar_lea.vmem %s4363_s2, 128 }
 0x15b   : > { %640 = vst.msk [vmem:[#allocation4 + $0x2f] sm:$0xfe] %vm633_vm3, %v5185_v36  ;;  %642 = vst.msk [vmem:[#allocation4 + $0x3f] sm:$0xfe] %vm633_vm3, %v5207_v38  ;;  %3582 = vmatprep.mubr.msk.f32.mxu1 %vm537_vm1, %v5281_v48  ;;  %v1998_v11 = vld [vmem:[#allocation4 + $0x10] sm:$0xff]  ;;  %p4361_p0 = pneg %p4360_p13  ;;  %p4366_p1 = scmp.lt.s32.totalorder %s4364_s23, %s4358_s28 }
 0x15c   : > { %610 = vst.msk [vmem:[#allocation3 + $0x41] sm:$0xff] %vm537_vm1, %v5207_v38  ;;  %643 = vst.msk [vmem:[#allocation4 + $0x47] sm:$0xff] %vm537_vm1, %v5209_v39  ;;  %v5285_v49 = vld [vmem:[#allocation3 + $0x18] sm:$0xff]  ;;  %3693 = vmatmul.mubr.msk.f32.gmra.mrb[4].mxu0 %vm537_vm1, %v5191_v37 }
 0x15d   : > { %612 = vst.msk [vmem:[#allocation3 + $0x51] sm:$0xff] %vm537_vm1, %v5213_v40  ;;  %645 = vst.msk [vmem:[#allocation4 + $0x57] sm:$0xff] %vm537_vm1, %v5222_v41  ;;  %v5287_v50 = vld [vmem:[#allocation3 + $0x20] sm:$0xff]  ;;  %3583 = vmatmul.mubr.msk.f32.vlgmr.msra.gmra.mrb[0].mxu1 %vm537_vm1, %v5285_v49  ;;  %3695 = vmatprep.mubr.msk.f32.mxu0 %vm537_vm1, %v5207_v38  ;;  %v5301_v53 = vld [vmem:[#allocation3 + $0x28] sm:$0xff]  ;;  %p4367_p3 = por %p4366_p1, %p4365_p8 }
 0x15e   : > { %644 = vst.msk [vmem:[#allocation4 + $0x4f] sm:$0xfe] %vm633_vm3, %v5213_v40  ;;  %646 = vst.msk [vmem:[#allocation4 + $0x5f] sm:$0xfe] %vm633_vm3, %v5226_v42  ;;  %v5293_v51 = vld [vmem:[#allocation2] sm:$0xff]  ;;  %3585 = vmatprep.mubr.msk.f32.mxu1 %vm537_vm1, %v5287_v50  ;;  %3607 = vmatpush3.msra.mxu1 %v5155_v22  ;;  %v5315_v55 = vld [vmem:[#allocation2 + $0x8] sm:$0xff] }
 0x15f   : > { %613 = vst.msk [vmem:[#allocation3 + $0x59] sm:$0x7f] %vm602_vm2, %v5222_v41  ;;  %615 = vst.msk [vmem:[#allocation3 + $0x69] sm:$0x7f] %vm602_vm2, %v5232_v43  ;;  %v5307_v54 = vld [vmem:[#allocation3 + $0x30] sm:$0xff]  ;;  %3632 = vmatprep.subr.mxu1 %v5295_v52  ;;  %v5460_v14 = vld [vmem:[#allocation4 + $0x20] sm:$0xff]  ;;  %p4368_p11 = pnand %p4367_p3, %p4361_p0 }
 0x160   : > { %614 = vst.msk [vmem:[#allocation3 + $0x61] sm:$0xff] %vm537_vm1, %v5226_v42  ;;  %647 = vst.msk [vmem:[#allocation4 + $0x67] sm:$0xff] %vm537_vm1, %v5232_v43  ;;  %3696 = vmatmul.mubr.msk.f32.gmra.mrb[6].mxu0 %vm537_vm1, %v5209_v39  ;;  %v5317_v56 = vld [vmem:[#allocation2 + $0x90] sm:$0xff]  ;;  %v5323_v57 = vld [vmem:[#allocation3 + $0x38] sm:$0xff] }
 0x161   : > { %616 = vst.msk [vmem:[#allocation3 + $0x71] sm:$0xff] %vm537_vm1, %v5241_v44  ;;  %649 = vst.msk [vmem:[#allocation4 + $0x77] sm:$0xff] %vm537_vm1, %v5247_v45  ;;  %3586 = vmatmul.mubr.msk.f32.gmra.mrb[2].mxu1 %vm537_vm1, %v5301_v53  ;;  %3698 = vmatprep.mubr.msk.f32.mxu0 %vm537_vm1, %v5213_v40  ;;  %v5329_v58 = vld [vmem:[#allocation2 + $0x98] sm:$0xff]  ;;  %v5469_v15 = vld [vmem:[#allocation4 + $0x28] sm:$0xff] }
 0x162   : > { %617 = vst.msk [vmem:[#allocation3 + $0x79] sm:$0x7f] %vm602_vm2, %v5247_v45  ;;  %619 = vst.msk [vmem:[#allocation3 + $0x89] sm:$0x7f] %vm602_vm2, %v5261_v47  ;;  %3588 = vmatprep.mubr.msk.f32.mxu1 %vm537_vm1, %v5307_v54  ;;  %v5471_v16 = vld [vmem:[#allocation4 + $0x30] sm:$0xff]  ;;  %v5481_v17 = vld [vmem:[#allocation4 + $0x38] sm:$0xff] }
 0x163   : > { %618 = vst.msk [vmem:[#allocation3 + $0x81] sm:$0xff] %vm537_vm1, %v5251_v46  ;;  %651 = vst.msk [vmem:[#allocation4 + $0x87] sm:$0xff] %vm537_vm1, %v5261_v47  ;;  %v5335_v59 = vld [vmem:[#allocation3 + $0x40] sm:$0xff]  ;;  %v5349_v60 = vld [vmem:[#allocation3 + $0x48] sm:$0xff] }
 0x164   : > { %648 = vst.msk [vmem:[#allocation4 + $0x6f] sm:$0xfe] %vm633_vm3, %v5241_v44  ;;  %650 = vst.msk [vmem:[#allocation4 + $0x7f] sm:$0xfe] %vm633_vm3, %v5251_v46  ;;  %3699 = vmatmul.mubr.msk.f32.gmra.mrb[8].mxu0 %vm537_vm1, %v5222_v41  ;;  %v5351_v61 = vld [vmem:[#allocation3 + $0x50] sm:$0xff]  ;;  %v5483_v18 = vld [vmem:[#allocation4 + $0x40] sm:$0xff] }
 0x165   : > { %601 = vst.msk [vmem:[#allocation3 + $0x1] sm:$0xff] %vm537_vm1, %v5293_v51  ;;  %635 = vst.msk [vmem:[#allocation4 + $0x7] sm:$0xff] %vm537_vm1, %v5315_v55  ;;  %3589 = vmatmul.mubr.msk.f32.gmra.mrb[4].mxu1 %vm537_vm1, %v5323_v57  ;;  %3701 = vmatprep.mubr.msk.f32.mxu0 %vm537_vm1, %v5226_v42  ;;  %v5493_v19 = vld [vmem:[#allocation4 + $0x48] sm:$0xff]  ;;  %v5495_v20 = vld [vmem:[#allocation4 + $0x50] sm:$0xff] }
 0x166   : > { %634 = vst.msk [vmem:[#allocation4 - $0x1] sm:$0xfe] %vm633_vm3, %v5293_v51  ;;  %652 = vst.msk [vmem:[#allocation4 + $0x8f] sm:$0xfe] %vm633_vm3, %v5317_v56  ;;  %3591 = vmatprep.mubr.msk.f32.mxu1 %vm537_vm1, %v5335_v59  ;;  %v5361_v62 = vld [vmem:[#allocation3 + $0x58] sm:$0xff] }
 0x167   : > { %603 = vst.msk [vmem:[#allocation3 + $0x9] sm:$0x7f] %vm602_vm2, %v5315_v55  ;;  %621 = vst.msk [vmem:[#allocation3 + $0x99] sm:$0x7f] %vm602_vm2, %v5329_v58  ;;  %v5363_v63 = vld [vmem:[#allocation3 + $0x60] sm:$0xff]  ;;  %v5373_v0 = vld [vmem:[#allocation3 + $0x68] sm:$0xff] }
 0x168   : > { %620 = vst.msk [vmem:[#allocation3 + $0x91] sm:$0xff] %vm537_vm1, %v5317_v56  ;;  %653 = vst.msk [vmem:[#allocation4 + $0x97] sm:$0xff] %vm537_vm1, %v5329_v58  ;;  %3702 = vmatmul.mubr.msk.f32.gmra.mrb[10].mxu0 %vm537_vm1, %v5232_v43  ;;  %v5375_v1 = vld [vmem:[#allocation3 + $0x70] sm:$0xff]  ;;  %v5505_v21 = vld [vmem:[#allocation4 + $0x58] sm:$0xff] }
 0x169   : > { %3592 = vmatmul.mubr.msk.f32.gmra.mrb[6].mxu1 %vm537_vm1, %v5349_v60  ;;  %3704 = vmatprep.mubr.msk.f32.mxu0 %vm537_vm1, %v5241_v44  ;;  %v5385_v2 = vld [vmem:[#allocation3 + $0x78] sm:$0xff]  ;;  %v5507_v22 = vld [vmem:[#allocation4 + $0x60] sm:$0xff]  ;;  %v2009_v23 = vld [vmem:[#allocation4 + $0x68] sm:$0xff] }
 0x16a   : > { %3594 = vmatprep.mubr.msk.f32.mxu1 %vm537_vm1, %v5351_v61  ;;  %v5387_v3 = vld [vmem:[#allocation3 + $0x80] sm:$0xff]  ;;  %v5396_v5 = vld [vmem:[#allocation3 + $0x88] sm:$0xff]  ;;  %v2011_v25 = vld [vmem:[#allocation4 + $0x78] sm:$0xff] }
 0x16b   : > { %v2010_v24 = vld [vmem:[#allocation4 + $0x70] sm:$0xff]  ;;  %v2239_v29 = vld [vmem:[#allocation4 + $0x88] sm:$0xff] }
 0x16c   : > { %3705 = vmatmul.mubr.msk.f32.gmra.mrb[12].mxu0 %vm537_vm1, %v5247_v45  ;;  %v664_v6 = vld [vmem:[#allocation3] sm:$0xff]  ;;  %v1997_v10 = vld [vmem:[#allocation4 + $0x8] sm:$0xff] }
 0x16d   : > { %3595 = vmatmul.mubr.msk.f32.gmra.mrb[8].mxu1 %vm537_vm1, %v5361_v62  ;;  %3707 = vmatprep.mubr.msk.f32.mxu0 %vm537_vm1, %v5251_v46  ;;  %v1996_v9 = vld [vmem:[#allocation4] sm:$0xff] }
 0x16e   : > { %3597 = vmatprep.mubr.msk.f32.mxu1 %vm537_vm1, %v5363_v63  ;;  %v665_v7 = vld [vmem:[#allocation3 + $0x8] sm:$0xff] }
 0x16f   : > { %v1102_v28 = vld [vmem:[#allocation3 + $0x98] sm:$0xff]  ;;  %v2466_v30 = vld [vmem:[#allocation4 + $0x90] sm:$0xff] }
 0x170   : > { %3708 = vmatmul.mubr.msk.f32.gmra.mrb[14].mxu0 %vm537_vm1, %v5261_v47  ;;  %v2467_v31 = vld [vmem:[#allocation4 + $0x98] sm:$0xff] }
 0x171   : > { %3598 = vmatmul.mubr.msk.f32.gmra.mrb[10].mxu1 %vm537_vm1, %v5373_v0  ;;  %3712 = vmatprep.mubr.msk.f32.mxu0 %vm537_vm1, %v5175_v33 }
 0x172   : > { %3600 = vmatprep.mubr.msk.f32.mxu1 %vm537_vm1, %v5375_v1 }
 0x174   : > { %3713 = vmatmul.mubr.msk.f32.vlgmr.msra.gmra.mrb[0].mxu0 %vm537_vm1, %v5177_v34 }
 0x175   : > { %3601 = vmatmul.mubr.msk.f32.gmra.mrb[12].mxu1 %vm537_vm1, %v5385_v2  ;;  %3737 = vmatpush3.msra.mxu0 %v5167_v27  ;;  %v1101_v27 = vld [vmem:[#allocation3 + $0x90] sm:$0xff] }
 0x176   : > { %3603 = vmatprep.mubr.msk.f32.mxu1 %vm537_vm1, %v5387_v3  ;;  %3715 = vmatprep.mubr.msk.f32.mxu0 %vm537_vm1, %v5185_v36 }
 0x177   : > { %3762 = vmatprep.subr.mxu0 %v2241_v4 }
 0x178   : > { %3716 = vmatmul.mubr.msk.f32.gmra.mrb[2].mxu0 %vm537_vm1, %v5191_v37 }
 0x179   : > { %3604 = vmatmul.mubr.msk.f32.gmra.mrb[14].mxu1 %vm537_vm1, %v5396_v5  ;;  %3718 = vmatprep.mubr.msk.f32.mxu0 %vm537_vm1, %v5207_v38 }
 0x17a   : > { %3608 = vmatprep.mubr.msk.f32.mxu1 %vm537_vm1, %v664_v6 }
 0x17c   : > { %3719 = vmatmul.mubr.msk.f32.gmra.mrb[4].mxu0 %vm537_vm1, %v5209_v39 }
 0x17d   : > { %3609 = vmatmul.mubr.msk.f32.vlgmr.msra.gmra.mrb[0].mxu1 %vm537_vm1, %v665_v7  ;;  %3721 = vmatprep.mubr.msk.f32.mxu0 %vm537_vm1, %v5213_v40 }
 0x17e   : > { %3611 = vmatprep.mubr.msk.f32.mxu1 %vm537_vm1, %v5281_v48  ;;  %3633 = vmatpush3.msra.mxu1 %v5295_v52 }
 0x17f   : > { %3658 = vmatprep.subr.mxu1 %v1331_v8 }
 0x180   : > { %3722 = vmatmul.mubr.msk.f32.gmra.mrb[6].mxu0 %vm537_vm1, %v5222_v41 }
 0x181   : > { %3612 = vmatmul.mubr.msk.f32.gmra.mrb[2].mxu1 %vm537_vm1, %v5285_v49  ;;  %3724 = vmatprep.mubr.msk.f32.mxu0 %vm537_vm1, %v5226_v42 }
 0x182   : > { %3614 = vmatprep.mubr.msk.f32.mxu1 %vm537_vm1, %v5287_v50 }
 0x184   : > { %3725 = vmatmul.mubr.msk.f32.gmra.mrb[8].mxu0 %vm537_vm1, %v5232_v43 }
 0x185   : > { %3615 = vmatmul.mubr.msk.f32.gmra.mrb[4].mxu1 %vm537_vm1, %v5301_v53  ;;  %3727 = vmatprep.mubr.msk.f32.mxu0 %vm537_vm1, %v5241_v44 }
 0x186   : > { %3617 = vmatprep.mubr.msk.f32.mxu1 %vm537_vm1, %v5307_v54 }
 0x188   : > { %3728 = vmatmul.mubr.msk.f32.gmra.mrb[10].mxu0 %vm537_vm1, %v5247_v45 }
 0x189   : > { %3618 = vmatmul.mubr.msk.f32.gmra.mrb[6].mxu1 %vm537_vm1, %v5323_v57  ;;  %3730 = vmatprep.mubr.msk.f32.mxu0 %vm537_vm1, %v5251_v46 }
 0x18a   : > { %3620 = vmatprep.mubr.msk.f32.mxu1 %vm537_vm1, %v5335_v59 }
 0x18c   : > { %3731 = vmatmul.mubr.msk.f32.gmra.mrb[12].mxu0 %vm537_vm1, %v5261_v47  ;;  %v5614_v47 = vld [vmem:[#allocation13] ss:$0 sm:$0xff] }
 0x18d   : > { %3621 = vmatmul.mubr.msk.f32.gmra.mrb[8].mxu1 %vm537_vm1, %v5349_v60  ;;  %3733 = vmatprep.mubr.msk.f32.mxu0 %vm537_vm1, %v5317_v56 }
 0x18e   : > { %3623 = vmatprep.mubr.msk.f32.mxu1 %vm537_vm1, %v5351_v61 }
 0x190   : > { %3734 = vmatmul.mubr.msk.f32.gmra.mrb[14].mxu0 %vm537_vm1, %v5329_v58 }
 0x191   : > { %3624 = vmatmul.mubr.msk.f32.gmra.mrb[10].mxu1 %vm537_vm1, %v5361_v62  ;;  %3738 = vmatprep.mubr.msk.f32.mxu0 %vm537_vm1, %v1996_v9 }
 0x192   : > { %3626 = vmatprep.mubr.msk.f32.mxu1 %vm537_vm1, %v5363_v63 }
 0x194   : > { %3739 = vmatmul.mubr.msk.f32.vlgmr.msra.gmra.mrb[0].mxu0 %vm537_vm1, %v1997_v10 }
 0x195   : > { %3627 = vmatmul.mubr.msk.f32.gmra.mrb[12].mxu1 %vm537_vm1, %v5373_v0  ;;  %3763 = vmatpush3.msra.mxu0 %v2241_v4 }
 0x196   : > { %3629 = vmatprep.mubr.msk.f32.mxu1 %vm537_vm1, %v5375_v1  ;;  %3741 = vmatprep.mubr.msk.f32.mxu0 %vm537_vm1, %v1998_v11 }
 0x197   : > { %3788 = vmatprep.subr.mxu0 %v2469_v12 }
 0x198   : > { %3742 = vmatmul.mubr.msk.f32.gmra.mrb[2].mxu0 %vm537_vm1, %v1999_v13 }
 0x199   : > { %3630 = vmatmul.mubr.msk.f32.gmra.mrb[14].mxu1 %vm537_vm1, %v5385_v2  ;;  %3744 = vmatprep.mubr.msk.f32.mxu0 %vm537_vm1, %v5460_v14 }
 0x19a   : > { %3634 = vmatprep.mubr.msk.f32.mxu1 %vm537_vm1, %v5287_v50 }
 0x19c   : > { %3745 = vmatmul.mubr.msk.f32.gmra.mrb[4].mxu0 %vm537_vm1, %v5469_v15 }
 0x19d   : > { %3635 = vmatmul.mubr.msk.f32.vlgmr.msra.gmra.mrb[0].mxu1 %vm537_vm1, %v5301_v53  ;;  %3747 = vmatprep.mubr.msk.f32.mxu0 %vm537_vm1, %v5471_v16 }
 0x19e   : > { %3637 = vmatprep.mubr.msk.f32.mxu1 %vm537_vm1, %v5307_v54  ;;  %3659 = vmatpush3.msra.mxu1 %v1331_v8 }
 0x1a0   : > { %3748 = vmatmul.mubr.msk.f32.gmra.mrb[6].mxu0 %vm537_vm1, %v5481_v17 }
 0x1a1   : > { %3638 = vmatmul.mubr.msk.f32.gmra.mrb[2].mxu1 %vm537_vm1, %v5323_v57  ;;  %3750 = vmatprep.mubr.msk.f32.mxu0 %vm537_vm1, %v5483_v18 }
 0x1a2   : > { %3640 = vmatprep.mubr.msk.f32.mxu1 %vm537_vm1, %v5335_v59 }
 0x1a4   : > { %3751 = vmatmul.mubr.msk.f32.gmra.mrb[8].mxu0 %vm537_vm1, %v5493_v19 }
 0x1a5   : > { %3641 = vmatmul.mubr.msk.f32.gmra.mrb[4].mxu1 %vm537_vm1, %v5349_v60  ;;  %3753 = vmatprep.mubr.msk.f32.mxu0 %vm537_vm1, %v5495_v20 }
 0x1a6   : > { %3643 = vmatprep.mubr.msk.f32.mxu1 %vm537_vm1, %v5351_v61 }
 0x1a8   : > { %3754 = vmatmul.mubr.msk.f32.gmra.mrb[10].mxu0 %vm537_vm1, %v5505_v21 }
 0x1a9   : > { %3644 = vmatmul.mubr.msk.f32.gmra.mrb[6].mxu1 %vm537_vm1, %v5361_v62  ;;  %3756 = vmatprep.mubr.msk.f32.mxu0 %vm537_vm1, %v5507_v22 }
 0x1aa   : > { %3646 = vmatprep.mubr.msk.f32.mxu1 %vm537_vm1, %v5363_v63 }
 0x1ac   : > { %3757 = vmatmul.mubr.msk.f32.gmra.mrb[12].mxu0 %vm537_vm1, %v2009_v23 }
 0x1ad   : > { %3647 = vmatmul.mubr.msk.f32.gmra.mrb[8].mxu1 %vm537_vm1, %v5373_v0  ;;  %3759 = vmatprep.mubr.msk.f32.mxu0 %vm537_vm1, %v2010_v24 }
 0x1ae   : > { %3649 = vmatprep.mubr.msk.f32.mxu1 %vm537_vm1, %v5375_v1 }
 0x1b0   : > { %3760 = vmatmul.mubr.msk.f32.gmra.mrb[14].mxu0 %vm537_vm1, %v2011_v25 }
 0x1b1   : > { %3650 = vmatmul.mubr.msk.f32.gmra.mrb[10].mxu1 %vm537_vm1, %v5385_v2  ;;  %3764 = vmatprep.mubr.msk.f32.mxu0 %vm537_vm1, %v1998_v11 }
 0x1b2   : > { %3652 = vmatprep.mubr.msk.f32.mxu1 %vm537_vm1, %v5387_v3 }
 0x1b4   : > { %3765 = vmatmul.mubr.msk.f32.vlgmr.msra.gmra.mrb[0].mxu0 %vm537_vm1, %v1999_v13 }
 0x1b5   : > { %3653 = vmatmul.mubr.msk.f32.gmra.mrb[12].mxu1 %vm537_vm1, %v5396_v5  ;;  %3789 = vmatpush3.msra.mxu0 %v2469_v12 }
 0x1b6   : > { %3655 = vmatprep.mubr.msk.f32.mxu1 %vm537_vm1, %v1101_v27  ;;  %3767 = vmatprep.mubr.msk.f32.mxu0 %vm537_vm1, %v5460_v14 }
 0x1b8   : > { %3768 = vmatmul.mubr.msk.f32.gmra.mrb[2].mxu0 %vm537_vm1, %v5469_v15 }
 0x1b9   : > { %3656 = vmatmul.mubr.msk.f32.gmra.mrb[14].mxu1 %vm537_vm1, %v1102_v28  ;;  %3770 = vmatprep.mubr.msk.f32.mxu0 %vm537_vm1, %v5471_v16 }
 0x1ba   : > { %3660 = vmatprep.mubr.msk.f32.mxu1 %vm537_vm1, %v5293_v51 }
 0x1bc   : > { %3771 = vmatmul.mubr.msk.f32.gmra.mrb[4].mxu0 %vm537_vm1, %v5481_v17 }
 0x1bd   : > { %3661 = vmatmul.mubr.msk.f32.vlgmr.msra.gmra.mrb[0].mxu1 %vm537_vm1, %v5315_v55  ;;  %3773 = vmatprep.mubr.msk.f32.mxu0 %vm537_vm1, %v5483_v18 }
 0x1be   : > { %3663 = vmatprep.mubr.msk.f32.mxu1 %vm537_vm1, %v5165_v26  ;;  %v2238_v26 = vld [vmem:[#allocation4 + $0x80] sm:$0xff] }
 0x1c0   : > { %3774 = vmatmul.mubr.msk.f32.gmra.mrb[6].mxu0 %vm537_vm1, %v5493_v19 }
 0x1c1   : > { %3664 = vmatmul.mubr.msk.f32.gmra.mrb[2].mxu1 %vm537_vm1, %v5173_v32  ;;  %3776 = vmatprep.mubr.msk.f32.mxu0 %vm537_vm1, %v5495_v20  ;;  %v2718_v32 = vld [vmem:[#allocation14] sm:$0xff] }
 0x1c2   : > { %3666 = vmatprep.mubr.msk.f32.mxu1 %vm537_vm1, %v5175_v33  ;;  %3814 = vmatprep.subr.mxu1 %v2718_v32 }
 0x1c3   : > { %3815 = vmatpush3.msra.mxu1 %v2718_v32 }
 0x1c4   : > { %3777 = vmatmul.mubr.msk.f32.gmra.mrb[8].mxu0 %vm537_vm1, %v5505_v21 }
 0x1c5   : > { %3667 = vmatmul.mubr.msk.f32.gmra.mrb[4].mxu1 %vm537_vm1, %v5177_v34  ;;  %3779 = vmatprep.mubr.msk.f32.mxu0 %vm537_vm1, %v5507_v22 }
 0x1c6   : > { %3669 = vmatprep.mubr.msk.f32.mxu1 %vm537_vm1, %v5185_v36 }
 0x1c8   : > { %3780 = vmatmul.mubr.msk.f32.gmra.mrb[10].mxu0 %vm537_vm1, %v2009_v23 }
 0x1c9   : > { %3670 = vmatmul.mubr.msk.f32.gmra.mrb[6].mxu1 %vm537_vm1, %v5191_v37  ;;  %3782 = vmatprep.mubr.msk.f32.mxu0 %vm537_vm1, %v2010_v24 }
 0x1ca   : > { %3672 = vmatprep.mubr.msk.f32.mxu1 %vm537_vm1, %v5207_v38 }
 0x1cc   : > { %3783 = vmatmul.mubr.msk.f32.gmra.mrb[12].mxu0 %vm537_vm1, %v2011_v25 }
 0x1cd   : > { %3673 = vmatmul.mubr.msk.f32.gmra.mrb[8].mxu1 %vm537_vm1, %v5209_v39  ;;  %3785 = vmatprep.mubr.msk.f32.mxu0 %vm537_vm1, %v2238_v26 }
 0x1ce   : > { %3675 = vmatprep.mubr.msk.f32.mxu1 %vm537_vm1, %v5213_v40 }
 0x1d0   : > { %3786 = vmatmul.mubr.msk.f32.gmra.mrb[14].mxu0 %vm537_vm1, %v2239_v29 }
 0x1d1   : > { %3676 = vmatmul.mubr.msk.f32.gmra.mrb[10].mxu1 %vm537_vm1, %v5222_v41  ;;  %3790 = vmatprep.mubr.msk.f32.mxu0 %vm537_vm1, %v5460_v14 }
 0x1d2   : > { %3678 = vmatprep.mubr.msk.f32.mxu1 %vm537_vm1, %v5226_v42 }
 0x1d4   : > { %3791 = vmatmul.mubr.msk.f32.vlgmr.msra.gmra.mrb[0].mxu0 %vm537_vm1, %v5469_v15 }
 0x1d5   : > { %3679 = vmatmul.mubr.msk.f32.gmra.mrb[12].mxu1 %vm537_vm1, %v5232_v43  ;;  %3793 = vmatprep.mubr.msk.f32.mxu0 %vm537_vm1, %v5471_v16 }
 0x1d6   : > { %3681 = vmatprep.mubr.msk.f32.mxu1 %vm537_vm1, %v5241_v44 }
 0x1d8   : > { %3794 = vmatmul.mubr.msk.f32.gmra.mrb[2].mxu0 %vm537_vm1, %v5481_v17 }
 0x1d9   : > { %3682 = vmatmul.mubr.msk.f32.gmra.mrb[14].mxu1 %vm537_vm1, %v5247_v45  ;;  %3796 = vmatprep.mubr.msk.f32.mxu0 %vm537_vm1, %v5483_v18 }
 0x1dc   : > { %3797 = vmatmul.mubr.msk.f32.gmra.mrb[4].mxu0 %vm537_vm1, %v5493_v19 }
 0x1dd   : > { %3799 = vmatprep.mubr.msk.f32.mxu0 %vm537_vm1, %v5495_v20 }
 0x1e0   : > { %3800 = vmatmul.mubr.msk.f32.gmra.mrb[6].mxu0 %vm537_vm1, %v5505_v21 }
 0x1e1   : > { %3802 = vmatprep.mubr.msk.f32.mxu0 %vm537_vm1, %v5507_v22 }
 0x1e4   : > { %3803 = vmatmul.mubr.msk.f32.gmra.mrb[8].mxu0 %vm537_vm1, %v2009_v23 }
 0x1e5   : > { %3805 = vmatprep.mubr.msk.f32.mxu0 %vm537_vm1, %v2010_v24 }
 0x1e8   : > { %3806 = vmatmul.mubr.msk.f32.gmra.mrb[10].mxu0 %vm537_vm1, %v2011_v25 }
 0x1e9   : > { %3808 = vmatprep.mubr.msk.f32.mxu0 %vm537_vm1, %v2238_v26 }
 0x1ec   : > { %3809 = vmatmul.mubr.msk.f32.gmra.mrb[12].mxu0 %vm537_vm1, %v2239_v29 }
 0x1ed   : > { %3811 = vmatprep.mubr.msk.f32.mxu0 %vm537_vm1, %v2466_v30 }
 0x1f0   : > { %3812 = vmatmul.mubr.msk.f32.gmra.mrb[14].mxu0 %vm537_vm1, %v2467_v31 }
 0x290   : > { %v3662_v33 = vpop.f32.mrb[0].mxu1 }
 0x291   : > { %v1446_v34 = vpop.f32.mrb[1].mxu1 }
 0x294   : > { %v3665_v35 = vpop.f32.mrb[2].mxu1 }
 0x295   : > { %v1456_v36 = vpop.f32.mrb[3].mxu1 }
 0x298   : > { %v3668_v37 = vpop.f32.mrb[4].mxu1 }
 0x299   : > { %v1466_v38 = vpop.f32.mrb[5].mxu1 }
 0x29c   : > { %v3671_v39 = vpop.f32.mrb[6].mxu1 }
 0x29d   : > { %v1476_v40 = vpop.f32.mrb[7].mxu1 }
 0x2a0   : > { %v3674_v41 = vpop.f32.mrb[8].mxu1 }
 0x2a1   : > { %v1486_v42 = vpop.f32.mrb[9].mxu1 }
 0x2a4   : > { %v3677_v43 = vpop.f32.mrb[10].mxu1 }
 0x2a5   : > { %v1496_v44 = vpop.f32.mrb[11].mxu1 }
 0x2a7   : > { %v3792_v46 = vpop.f32.mrb[0].mxu0 }
 0x2a8   : > { %v3680_v45 = vpop.f32.mrb[12].mxu1  ;;  %v3840_v48 = vadd.f32 %v3792_v46, %v3662_v33  ;;  %v2584_v50 = vpop.f32.mrb[1].mxu0 }
 0x2a9   : > { %v1506_v49 = vpop.f32.mrb[13].mxu1  ;;  %v3841_v51 = vadd.f32 %v2584_v50, %v1446_v34 }
 0x2aa   : > { %v2687_v52 = vadd.f32 %v3840_v48, %v5614_v47 }
 0x2ab   : > { %v2686_v53 = vadd.f32 %v3841_v51, %v5614_v47  ;;  %v3795_v55 = vpop.f32.mrb[2].mxu0  ;;  %v3384_v51 = vld [vmem:[#allocation16] ss:$0 sm:$0xff] }
 0x2ac   : > { %v3683_v54 = vpop.f32.mrb[14].mxu1  ;;  %v3842_v56 = vadd.f32 %v3795_v55, %v3665_v35  ;;  %v2594_v58 = vpop.f32.mrb[3].mxu0  ;;  %v2703_v61 = vmax.f32 %v2687_v52, 0.0 }
 0x2ad   : > { %v5618_v57 = vpop.f32.mrb[15].mxu1  ;;  %v2702_v59 = vmax.f32 %v2686_v53, 0.0  ;;  %v3843_v60 = vadd.f32 %v2594_v58, %v1456_v36 }
 0x2ae   : > { %v2689_v62 = vadd.f32 %v3842_v56, %v5614_v47 }
 0x2af   : > { %v2688_v63 = vadd.f32 %v3843_v60, %v5614_v47  ;;  %v3798_v0 = vpop.f32.mrb[4].mxu0  ;;  %3816 = vmatprep.mubr.msk.f32.mxu1 %vm537_vm1, %v2702_v59 }
 0x2b0   : > { %v3844_v1 = vadd.f32 %v3798_v0, %v3668_v37  ;;  %v2604_v2 = vpop.f32.mrb[5].mxu0  ;;  %3817 = vmatmul.mubr.msk.f32.vlgmr.msra.gmra.mrb[16].mxu1 %vm537_vm1, %v2703_v61  ;;  %v2705_v5 = vmax.f32 %v2689_v62, 0.0 }
 0x2b1   : > { %v2704_v3 = vmax.f32 %v2688_v63, 0.0  ;;  %v3845_v4 = vadd.f32 %v2604_v2, %v1466_v38 }
 0x2b2   : > { %v2691_v6 = vadd.f32 %v3844_v1, %v5614_v47 }
 0x2b3   : > { %v2690_v7 = vadd.f32 %v3845_v4, %v5614_v47  ;;  %v3801_v8 = vpop.f32.mrb[6].mxu0  ;;  %3819 = vmatprep.mubr.msk.f32.mxu1 %vm537_vm1, %v2704_v3 }
 0x2b4   : > { %v3846_v9 = vadd.f32 %v3801_v8, %v3671_v39  ;;  %v2614_v10 = vpop.f32.mrb[7].mxu0  ;;  %3820 = vmatmul.mubr.msk.f32.gmra.mrb[18].mxu1 %vm537_vm1, %v2705_v5  ;;  %v2707_v13 = vmax.f32 %v2691_v6, 0.0 }
 0x2b5   : > { %v2706_v11 = vmax.f32 %v2690_v7, 0.0  ;;  %v3847_v12 = vadd.f32 %v2614_v10, %v1476_v40 }
 0x2b6   : > { %v2693_v14 = vadd.f32 %v3846_v9, %v5614_v47 }
 0x2b7   : > { %v2692_v15 = vadd.f32 %v3847_v12, %v5614_v47  ;;  %v3804_v16 = vpop.f32.mrb[8].mxu0  ;;  %3822 = vmatprep.mubr.msk.f32.mxu1 %vm537_vm1, %v2706_v11 }
 0x2b8   : > { %v3848_v17 = vadd.f32 %v3804_v16, %v3674_v41  ;;  %v2624_v18 = vpop.f32.mrb[9].mxu0  ;;  %3823 = vmatmul.mubr.msk.f32.gmra.mrb[20].mxu1 %vm537_vm1, %v2707_v13  ;;  %v2709_v21 = vmax.f32 %v2693_v14, 0.0 }
 0x2b9   : > { %v2708_v19 = vmax.f32 %v2692_v15, 0.0  ;;  %v3849_v20 = vadd.f32 %v2624_v18, %v1486_v42 }
 0x2ba   : > { %v2695_v22 = vadd.f32 %v3848_v17, %v5614_v47 }
 0x2bb   : > { %v2694_v23 = vadd.f32 %v3849_v20, %v5614_v47  ;;  %v3807_v24 = vpop.f32.mrb[10].mxu0  ;;  %3825 = vmatprep.mubr.msk.f32.mxu1 %vm537_vm1, %v2708_v19 }
 0x2bc   : > { %v3850_v25 = vadd.f32 %v3807_v24, %v3677_v43  ;;  %v2634_v27 = vpop.f32.mrb[11].mxu0  ;;  %3826 = vmatmul.mubr.msk.f32.gmra.mrb[22].mxu1 %vm537_vm1, %v2709_v21  ;;  %v2711_v29 = vmax.f32 %v2695_v22, 0.0 }
 0x2bd   : > { %v2710_v28 = vmax.f32 %v2694_v23, 0.0  ;;  %v3851_v26 = vadd.f32 %v2634_v27, %v1496_v44 }
 0x2be   : > { %v2697_v30 = vadd.f32 %v3850_v25, %v5614_v47 }
 0x2bf   : > { %v2696_v31 = vadd.f32 %v3851_v26, %v5614_v47  ;;  %v3810_v32 = vpop.f32.mrb[12].mxu0  ;;  %3828 = vmatprep.mubr.msk.f32.mxu1 %vm537_vm1, %v2710_v28 }
 0x2c0   : > { %v3852_v33 = vadd.f32 %v3810_v32, %v3680_v45  ;;  %v2644_v34 = vpop.f32.mrb[13].mxu0  ;;  %3829 = vmatmul.mubr.msk.f32.gmra.mrb[24].mxu1 %vm537_vm1, %v2711_v29  ;;  %v2713_v37 = vmax.f32 %v2697_v30, 0.0 }
 0x2c1   : > { %v2712_v35 = vmax.f32 %v2696_v31, 0.0  ;;  %v3853_v36 = vadd.f32 %v2644_v34, %v1506_v49 }
 0x2c2   : > { %v2699_v38 = vadd.f32 %v3852_v33, %v5614_v47 }
 0x2c3   : > { %v2698_v39 = vadd.f32 %v3853_v36, %v5614_v47  ;;  %v3813_v40 = vpop.f32.mrb[14].mxu0  ;;  %3831 = vmatprep.mubr.msk.f32.mxu1 %vm537_vm1, %v2712_v35 }
 0x2c4   : > { %v3854_v41 = vadd.f32 %v3813_v40, %v3683_v54  ;;  %v2654_v42 = vpop.f32.mrb[15].mxu0  ;;  %3832 = vmatmul.mubr.msk.f32.gmra.mrb[26].mxu1 %vm537_vm1, %v2713_v37  ;;  %v2715_v45 = vmax.f32 %v2699_v38, 0.0 }
 0x2c5   : > { %v2714_v43 = vmax.f32 %v2698_v39, 0.0  ;;  %v3855_v44 = vadd.f32 %v2654_v42, %v5618_v57 }
 0x2c6   : > { %v2701_v46 = vadd.f32 %v3854_v41, %v5614_v47 }
 0x2c7   : > { %v2700_v48 = vadd.f32 %v3855_v44, %v5614_v47  ;;  %3834 = vmatprep.mubr.msk.f32.mxu1 %vm537_vm1, %v2714_v43 }
 0x2c8   : > { %3835 = vmatmul.mubr.msk.f32.gmra.mrb[28].mxu1 %vm537_vm1, %v2715_v45  ;;  %v2717_v50 = vmax.f32 %v2701_v46, 0.0 }
 0x2c9   : > { %v2716_v49 = vmax.f32 %v2700_v48, 0.0 }
 0x2cb   : > { %3837 = vmatprep.mubr.msk.f32.mxu1 %vm537_vm1, %v2716_v49 }
 0x2cc   : > { %3838 = vmatmul.mubr.msk.f32.gmra.mrb[30].mxu1 %vm537_vm1, %v2717_v50 }
 0x383   : > { %v3818_v52 = vpop.f32.mrb[16].mxu1 }
 0x384   : > { %v2840_v53 = vpop.f32.mrb[17].mxu1  ;;  %v2846_v57 = vadd.f32 %v3818_v52, %v3384_v51 }
 0x385   : > { %v2841_v54 = vadd.f32 %v3384_v51, %v2840_v53 }
 0x387   : > { %v3821_v55 = vpop.f32.mrb[18].mxu1  ;;  %2919 = vxpose.xlu0.b32.start [1/16] (narrow) %v2841_v54, 16 }
 0x388   : > { %v2850_v56 = vpop.f32.mrb[19].mxu1  ;;  %v2856_v62 = vadd.f32 %v3821_v55, %v3384_v51 }
 0x389   : > { %v2851_v59 = vadd.f32 %v3384_v51, %v2850_v56 }
 0x38b   : > { %v3824_v58 = vpop.f32.mrb[20].mxu1  ;;  %2920 = vxpose.xlu0.b32.cont [2/16] (narrow) %v2846_v57, 16 }
 0x38c   : > { %v2860_v47 = vpop.f32.mrb[21].mxu1  ;;  %v2866_v4 = vadd.f32 %v3824_v58, %v3384_v51 }
 0x38d   : > { %v2861_v1 = vadd.f32 %v3384_v51, %v2860_v47 }
 0x38f   : > { %v3827_v60 = vpop.f32.mrb[22].mxu1  ;;  %2921 = vxpose.xlu0.b32.cont [3/16] (narrow) %v2851_v59, 16 }
 0x390   : > { %v2870_v61 = vpop.f32.mrb[23].mxu1  ;;  %v2876_v10 = vadd.f32 %v3827_v60, %v3384_v51 }
 0x391   : > { %v2871_v7 = vadd.f32 %v3384_v51, %v2870_v61 }
 0x393   : > { %v3830_v63 = vpop.f32.mrb[24].mxu1  ;;  %2922 = vxpose.xlu0.b32.cont [4/16] (narrow) %v2856_v62, 16 }
 0x394   : > { %v2880_v0 = vpop.f32.mrb[25].mxu1  ;;  %v2886_v12 = vadd.f32 %v3830_v63, %v3384_v51 }
 0x395   : > { %v2881_v11 = vadd.f32 %v3384_v51, %v2880_v0 }
 0x397   : > { %v3833_v2 = vpop.f32.mrb[26].mxu1  ;;  %2923 = vxpose.xlu0.b32.cont [5/16] (narrow) %v2861_v1, 16 }
 0x398   : > { %v2890_v3 = vpop.f32.mrb[27].mxu1  ;;  %v2896_v14 = vadd.f32 %v3833_v2, %v3384_v51 }
 0x399   : > { %v2891_v13 = vadd.f32 %v3384_v51, %v2890_v3 }
 0x39b   : > { %v3836_v5 = vpop.f32.mrb[28].mxu1  ;;  %2924 = vxpose.xlu0.b32.cont [6/16] (narrow) %v2866_v4, 16 }
 0x39c   : > { %v2900_v6 = vpop.f32.mrb[29].mxu1  ;;  %v2906_v16 = vadd.f32 %v3836_v5, %v3384_v51 }
 0x39d   : > { %v2901_v15 = vadd.f32 %v3384_v51, %v2900_v6 }
 0x39f   : > { %v3839_v8 = vpop.f32.mrb[30].mxu1  ;;  %2925 = vxpose.xlu0.b32.cont [7/16] (narrow) %v2871_v7, 16 }
 0x3a0   : > { %v2910_v9 = vpop.f32.mrb[31].mxu1  ;;  %v2916_v18 = vadd.f32 %v3839_v8, %v3384_v51 }
 0x3a1   : > { %v2911_v17 = vadd.f32 %v3384_v51, %v2910_v9 }
 0x3a3   : > { %2926 = vxpose.xlu0.b32.cont [8/16] (narrow) %v2876_v10, 16 }
 0x3a7   : > { %2927 = vxpose.xlu0.b32.cont [9/16] (narrow) %v2881_v11, 16 }
 0x3ab   : > { %2928 = vxpose.xlu0.b32.cont [10/16] (narrow) %v2886_v12, 16 }
 0x3af   : > { %2929 = vxpose.xlu0.b32.cont [11/16] (narrow) %v2891_v13, 16 }
 0x3b3   : > { %2930 = vxpose.xlu0.b32.cont [12/16] (narrow) %v2896_v14, 16 }
 0x3b7   : > { %2931 = vxpose.xlu0.b32.cont [13/16] (narrow) %v2901_v15, 16 }
 0x3bb   : > { %2932 = vxpose.xlu0.b32.cont [14/16] (narrow) %v2906_v16, 16 }
 0x3bf   : > { %2933 = vxpose.xlu0.b32.cont [15/16] (narrow) %v2911_v17, 16 }
 0x3c3   : > { %2934 = vxpose.xlu0.b32.end [16/16] (narrow) %v2916_v18, 16 }
 0x407   : > { %v2935_v19 = vpop.trf.xlu0 }
 0x408   : > { %2951 = vst [vmem:[%s509_s22] sm:$0x7] %v2935_v19  ;;  %2952 = vst [vmem:[%s5657_s17 - $0x3] sm:$0xf8] %v2935_v19 }
 0x409   : > { %4371 = shalt.err (!%p4368_p11)
}
 0x40a   : > { %s4372_s22 = scalar_lea.hbm %s5665_s25, 64  ;;  %s4376_s1 = scalar_lea.hbm %s5890_s19, 256 }
 0x40b   : > { %p4373_p2 = scmp.ne.s32.totalorder %s5665_s25, %s4372_s22  ;;  %p4377_p12 = scmp.lt.u32.totalorder %s5665_s25, %s5890_s19 }
 0x40c   : > { %p4378_p5 = scmp.lt.u32.totalorder %s4376_s1, %s4372_s22  ;;  %p4380_p4 = scmp.lt.u32.totalorder %s4372_s22, %s5665_s25 }
 0x40d   : > { %p4374_p10 = pnand %p4373_p2, %p5892_p9 }
 0x40e   : > { %p4379_p7 = por %p4378_p5, %p4377_p12 }
 0x40f   : > { %p4375_p6 = pneg %p4374_p10 }
 0x410   : > { %p4381_p13 = por %p4380_p4, %p4379_p7 }
 0x412   : > { %p4382_p0 = pnand %p4381_p13, %p4375_p6 }
 0x414   : > { %4385 = shalt.err (!%p4382_p0)
}
 0x415   : > { %3990 = dma.vmem_to_hbm [thread:$0]  (%p5892_p9), %s5660_s7, 64, %s5665_s25, %s2955_s3   ;;  %v2936_v20 = vpop.trf.xlu0 }
 0x416   : > { %2953 = vst [vmem:[%s5657_s17 + $0x5] sm:$0x7f] %v2936_v20  ;;  %s2960_s29 = scalar_lea.sflag [#allocation19], %s5068_s15  ;;  %s4386_s5 = scalar_lea.vmem %s5667_s24, 256 }
 0x417   : > { %p4387_p8 = scmp.ne.s32.totalorder %s5667_s24, %s4386_s5  ;;  %s4565_s28 = smov [#allocation18]  }
 0x418   : > { %s4390_s16 = sshll.u32 %s4565_s28, 4  ;;  %s4391_s16 = int_to_ptr.vmem [resolvable:$false] %s4390_s16 }
 0x419   : > { %p4388_p1 = pnand %p4387_p8, %p5892_p9  ;;  %s4392_s2 = scalar_lea.vmem %s4391_s16, 512 }
 0x41a   : > { %p4393_p11 = scmp.lt.s32.totalorder %s5667_s24, %s4391_s16  ;;  %p4394_p2 = scmp.lt.s32.totalorder %s4392_s2, %s4386_s5 }
 0x41b   : > { %p4389_p3 = pneg %p4388_p1 }
 0x41c   : > { %p4395_p10 = por %p4394_p2, %p4393_p11 }
 0x41e   : > { %p4396_p6 = pnand %p4395_p10, %p4389_p3 }
 0x420   : > { %4399 = shalt.err (!%p4396_p6)
}
 0x421   : > { %s4400_s7 = scalar_lea.hbm %s5673_s20, 256  ;;  %s4404_s3 = scalar_lea.hbm %s5891_s8, 1024 }
 0x422   : > { %p4401_p12 = scmp.ne.s32.totalorder %s5673_s20, %s4400_s7  ;;  %p4405_p4 = scmp.lt.u32.totalorder %s5673_s20, %s5891_s8 }
 0x423   : > { %p4406_p13 = scmp.lt.u32.totalorder %s4404_s3, %s4400_s7  ;;  %p4408_p8 = scmp.lt.u32.totalorder %s4400_s7, %s5673_s20 }
 0x424   : > { %p4402_p5 = pnand %p4401_p12, %p5892_p9 }
 0x425   : > { %p4407_p0 = por %p4406_p13, %p4405_p4 }
 0x426   : > { %p4403_p7 = pneg %p4402_p5 }
 0x427   : > { %p4409_p1 = por %p4408_p8, %p4407_p0 }
 0x429   : > { %p4410_p3 = pnand %p4409_p1, %p4403_p7 }
 0x42b   : > { %4413 = shalt.err (!%p4410_p3)
}
 0x42c   : > { %s4566_s26 = smov 128   ;;  %s4567_s14 = smov 256  }
 0x42d   : > { %s4568_s1 = smov 8  }
 0x42e   : > { %3991 = dma.vmem_to_hbm [thread:$0]  (%p5892_p9), %s5667_s24, 256, %s5673_s20, %s2960_s29, %s4566_s26, %s4567_s14, %s4568_s1  }
 0x42f PF: > { %s5893_s21 = sld [smem:[#allocation30_spill]]  ;;  %s5894_s4 = sld [smem:[#allocation40_spill]] }
 0x430   : > { %p4033_p11 = scmp.ge.s32.totalorder %s4552_s18, 2 }
 0x435   : > { %s3004_s5 = sand.u32 1, %s5893_s21   ;;  %p5895_p2 = scmp.ne.s32.totalorder %s5894_s4, 0 }
 0x436   : > { %s3005_s28 = scalar_lea.sflag [#allocation7], %s3004_s5 }
 0x437   : > { %p4018_p10 = pnand %p4033_p11, %p5895_p2 }
 0x439   : > { %4491 = dma.done.wait (!%p4018_p10), %s3005_s28, 64  }
 0x43a   : > { %4493 = vsyncadd (!%p4018_p10), %s3005_s28, 4294967232  ;;  %s3014_s16 = scalar_lea.sflag [#allocation19], %s3004_s5 }
 0x43b   : > { %4495 = dma.done.wait (!%p4018_p10), %s3014_s16, 256  }
 0x43c   : > { %4497 = vsyncadd (!%p4018_p10), %s3014_s16, 4294967040  ;;  %s33_s18 = sadd.s32 1, %s4552_s18   ;;  %s5897_s15 = sld [smem:[#allocation28_spill]] }
 0x43d   : > { %p5727_p6 = scmp.ge.s32.totalorder %s33_s18, 6   ;;  %s5898_s28 = sld [smem:[#allocation29_spill]] }
 0x43e   : > { %s5899_s24 = sld [smem:[#allocation31_spill]]  ;;  %s5900_s20 = smov %s4933_s27 }
 0x43f   : > { %s5901_s2 = smov %s4924_s11  ;;  %s5902_s14 = sld [smem:[#allocation34_spill]] }
 0x440   : > { %s5903_s7 = sld [smem:[#allocation35_spill]]  ;;  %s5904_s16 = sld [smem:[#allocation37_spill]] }
 0x441   : > { %s5905_s17 = sld [smem:[#allocation41_spill]]  ;;  %s5908_s29 = smov %s5931_s9 }
 0x442   : > { %s5907_s27 = smov %s5897_s15  ;;  %s5910_s9 = smov %s4520_s10 }
 0x443   : > { %s5911_s10 = smov %s5900_s20  ;;  %s5912_s11 = smov %s4528_s12 }
 0x444   : > { %s5909_s30 = smov %s5899_s24  ;;  %s5913_s12 = smov %s4532_s13 }
 0x445   : > { %s5914_s13 = smov %s5901_s2  ;;  %32 = sbr.rel (!%p5727_p6) target bundleno = 25 (0x19), region = 165 }
 0x446   : > { %s5915_s15 = smov %s5903_s7 }
 0x44c   :  { %3019 = vsyncpa [#allocation6], 1 }
 0x44d   :  { %3021 = vsyncpa [#allocation6 + $0x1], 1 }
 0x44e   :  { %3022 = vsyncpa [#allocation9], 1 }
 0x44f   :  { %3024 = vsyncpa [#allocation9 + $0x1], 1 }
 0x450   :  { %3025 = vsyncpa [#allocation12], 1 }
 0x451   :  { %3026 = vsyncpa [#allocation15], 1 }
 0x452   :  { %3027 = vsyncpa [#allocation7], 1 }
 0x453   :  { %3029 = vsyncpa [#allocation7 + $0x1], 1 }
 0x454   :  { %3030 = vsyncpa [#allocation19], 1 }
 0x455   :  { %3032 = vsyncpa [#allocation19 + $0x1], 1 }

</bundles_post_ra>
